<compile_context>
chip_gen: v7x
topology: tpu7x:2x2x1
jax: 0.10.0
libtpu: 0.0.40
codegen_flags: <defaults>
</compile_context>

<pallas_src>
import jax
import jax.numpy as jnp
import numpy as np
from jax.experimental import pallas as pl
from jax.experimental.pallas import tpu as pltpu

FEATURE_DIM = 32
HIDDEN_DIMS = [256, 512, 256]
TIME_EMBED_DIM = 128
BATCH = 2

# --- lane offsets inside the packed K=128 bf16 weight slab ------------------
_W128_WT1 = 0                          # (128, 512)  time-embed layer 1
_W128_WTP = 512                        # (128, 768)  wtp0 | wtp1 fused
_W128_WI = 1280                        # (128, 256)  input proj, K zero-padded 32 -> 128
_W128_WIDTH = 1536

# --- lane offsets inside the packed f32 constant slab ------------------------
_OFF_FREQS = 0                         # (1, 128)  tiled sinusoidal freqs
_OFF_BT1 = 128                         # (1, 512)
_OFF_BT2 = 640                         # (1, 128)
_OFF_BI = 768                          # (1, 256)
_OFF_BTP = 1024                        # (1, 768)  btp0 | btp1 fused
_OFF_BL0 = 1792                        # (1, 512)
_OFF_BL1 = 2304                        # (1, 256)
_OFF_BO = 2560                         # (1, 128)  bo zero-padded to 128 lanes
_CONSTS_WIDTH = 2688


def _mlp_kernel(act_ref, w128_ref, w256_ref, w512_ref, consts_ref, out_ref):
    f32 = jnp.float32
    bf16 = jnp.bfloat16
    B = act_ref.shape[0]
    D = TIME_EMBED_DIM

    # ---- packed constants (biases + frequency table) ----
    freqs = consts_ref[:, _OFF_FREQS:_OFF_FREQS + D]            # (1, 128)
    bt1 = consts_ref[:, _OFF_BT1:_OFF_BT1 + 512]
    bt2 = consts_ref[:, _OFF_BT2:_OFF_BT2 + 128]
    bi = consts_ref[:, _OFF_BI:_OFF_BI + 256]
    btp = consts_ref[:, _OFF_BTP:_OFF_BTP + 768]
    bl0 = consts_ref[:, _OFF_BL0:_OFF_BL0 + 512]
    bl1 = consts_ref[:, _OFF_BL1:_OFF_BL1 + 256]
    bo = consts_ref[:, _OFF_BO:_OFF_BO + 128]

    # ---- activation slab: lanes 0:32 = x, lane 32 = time, rest zero ----
    act = act_ref[...]                                           # (B, 128) f32
    t_in = act[:, FEATURE_DIM:FEATURE_DIM + 1]                   # (B, 1)

    # ---- sinusoidal time embedding, lane-dense (no (B,64) concat) ----
    arg = t_in * freqs                                           # (B, 128)
    lane = jax.lax.broadcasted_iota(jnp.int32, (B, D), 1)
    emb = jnp.where(lane < D // 2, jnp.sin(arg), jnp.cos(arg))   # (B, 128) f32

    def mm(a, w, b):
        # bf16 x bf16 MXU matmul, f32 accumulate, f32 bias add.
        return jnp.dot(a.astype(bf16), w, preferred_element_type=f32) + b

    # ---- time-embedding MLP ----
    t = jax.nn.silu(mm(emb, w128_ref[:, _W128_WT1:_W128_WT1 + 512], bt1))   # (B, 512)
    t = mm(t, w512_ref[:, 0:128], bt2)                                      # (B, 128)

    # ---- input projection: full slab against K-zero-padded wi (rows >=32 are zero) ----
    h = jax.nn.silu(mm(act, w128_ref[:, _W128_WI:_W128_WI + 256], bi))      # (B, 256)

    # ---- fused time projections for both layers (one MXU pass) ----
    te = mm(t, w128_ref[:, _W128_WTP:_W128_WTP + 768], btp)                 # (B, 768)

    # ---- layer 0 (dropout = identity in eval) ----
    h = jax.nn.silu(mm(h + te[:, 0:256], w256_ref[:, 0:512], bl0))          # (B, 512)

    # ---- layer 1 (dropout = identity in eval) ----
    h = jax.nn.silu(mm(h + te[:, 256:768], w512_ref[:, 128:384], bl1))      # (B, 256)

    # ---- output projection, lane-dense (wo/bo zero-padded to 128 lanes; Identity final act) ----
    out_ref[...] = mm(h, w256_ref[:, 512:640], bo)                          # (B, 128)


def prepare_params(params):
    """One-time packing: bf16 weight slabs (by shared K dim) + one f32 constant slab.

    Call once at parameter-load time and reuse the result for every forward call
    (the per-call wrapper does no weight concat/cast work).
    """
    bf16 = jnp.bfloat16
    F = FEATURE_DIM

    # K=128: wt1 (128,512) | wtp0 (128,256) | wtp1 (128,512) | wi padded (128,256) -> (128,1536)
    wi_pad = jnp.pad(params["wi"], ((0, TIME_EMBED_DIM - F), (0, 0)))       # (128, 256)
    w128 = jnp.concatenate(
        [params["wt1"], params["wtp0"], params["wtp1"], wi_pad], axis=1).astype(bf16)
    assert w128.shape == (TIME_EMBED_DIM, _W128_WIDTH)

    # K=512: wt2 (512,128) | wl1 (512,256) -> (512, 384)
    w512 = jnp.concatenate([params["wt2"], params["wl1"]], axis=1).astype(bf16)

    # K=256: wl0 (256,512) | wo padded to (256,128) -> (256, 640)
    wo_pad = jnp.pad(params["wo"], ((0, 0), (0, 128 - F)))
    w256 = jnp.concatenate([params["wl0"], wo_pad], axis=1).astype(bf16)

    # f32 constant slab: sinusoidal frequency table + all biases, lane-aligned.
    half = TIME_EMBED_DIM // 2
    log_scale = np.log(10000.0) / (half - 1)
    freqs = np.exp(-log_scale * np.arange(half, dtype=np.float32)).astype(np.float32)
    freqs_full = np.concatenate([freqs, freqs]).reshape(1, TIME_EMBED_DIM)   # (1, 128)
    bo_pad = jnp.pad(params["bo"], ((0, 0), (0, 128 - F)))
    consts = jnp.concatenate(
        [jnp.asarray(freqs_full, jnp.float32),
         params["bt1"], params["bt2"], params["bi"],
         params["btp0"], params["btp1"],
         params["bl0"], params["bl1"], bo_pad],
        axis=1).astype(jnp.float32)                                          # (1, 2688)
    assert consts.shape[1] == _CONSTS_WIDTH

    return {"w128": w128, "w256": w256, "w512": w512, "consts": consts}


def time_conditioned_mlp(x, time, packed):
    """x: (B, F) f32, time: (B,) f32, packed: output of prepare_params()."""
    B, F = x.shape
    time2d = time.reshape(B, 1).astype(jnp.float32)

    # Single lane-padded activation slab: lanes 0:F = x, lane F = time, rest zero.
    act = jnp.concatenate(
        [x.astype(jnp.float32), time2d,
         jnp.zeros((B, TIME_EMBED_DIM - F - 1), jnp.float32)], axis=1)       # (B, 128)

    # Advisory cost: 7 matmuls + sin/cos + SiLU exps; ~1.1 MiB of (mostly weight) bytes.
    flops = 2 * B * (128 * 512 + 512 * 128 + 128 * 768 + 128 * 256
                     + 256 * 512 + 512 * 256 + 256 * 128)
    transcendentals = B * (128 + 512 + 256 + 512 + 256)
    bytes_accessed = (_W128_WIDTH * 128 + 640 * 256 + 384 * 512) * 2 \
        + _CONSTS_WIDTH * 4 + (B * 128 * 2) * 4

    vmem = pl.BlockSpec(memory_space=pltpu.MemorySpace.VMEM)
    out_pad = pl.pallas_call(
        _mlp_kernel,
        out_shape=jax.ShapeDtypeStruct((B, 128), jnp.float32),   # lane-dense output
        in_specs=[vmem] * 5,
        out_specs=vmem,
        compiler_params=pltpu.CompilerParams(vmem_limit_bytes=8 * 1024 * 1024),
        cost_estimate=pl.CostEstimate(flops=flops,
                                      transcendentals=transcendentals,
                                      bytes_accessed=bytes_accessed),
    )(act, packed["w128"], packed["w256"], packed["w512"], packed["consts"])
    return out_pad[:, :F]


def _init_params(key):
    """Deterministic synthetic parameters, already transposed to (in, out)."""
    def linear(key, fan_in, fan_out):
        kw, kb = jax.random.split(key)
        scale = 1.0 / np.sqrt(fan_in)
        w = jax.random.uniform(kw, (fan_in, fan_out), jnp.float32, -scale, scale)
        b = jax.random.uniform(kb, (1, fan_out), jnp.float32, -scale, scale)
        return w, b

    keys = jax.random.split(key, 8)
    p = {}
    p["wt1"], p["bt1"] = linear(keys[0], TIME_EMBED_DIM, TIME_EMBED_DIM * 4)
    p["wt2"], p["bt2"] = linear(keys[1], TIME_EMBED_DIM * 4, TIME_EMBED_DIM)
    p["wi"], p["bi"] = linear(keys[2], FEATURE_DIM, HIDDEN_DIMS[0])
    p["wtp0"], p["btp0"] = linear(keys[3], TIME_EMBED_DIM, HIDDEN_DIMS[0])
    p["wl0"], p["bl0"] = linear(keys[4], HIDDEN_DIMS[0], HIDDEN_DIMS[1])
    p["wtp1"], p["btp1"] = linear(keys[5], TIME_EMBED_DIM, HIDDEN_DIMS[1])
    p["wl1"], p["bl1"] = linear(keys[6], HIDDEN_DIMS[1], HIDDEN_DIMS[2])
    p["wo"], p["bo"] = linear(keys[7], HIDDEN_DIMS[2], FEATURE_DIM)
    return p


def _reference(x, time, p):
    """Pure-JAX f32 reference of the PyTorch forward (eval mode)."""
    half = TIME_EMBED_DIM // 2
    c = jnp.log(10000.0) / (half - 1)
    freqs = jnp.exp(jnp.arange(half, dtype=jnp.float32) * -c)
    arg = time[:, None] * freqs[None, :]
    emb = jnp.concatenate([jnp.sin(arg), jnp.cos(arg)], axis=-1)
    t = jax.nn.silu(emb @ p["wt1"] + p["bt1"]) @ p["wt2"] + p["bt2"]
    h = jax.nn.silu(x @ p["wi"] + p["bi"])
    h = jax.nn.silu((h + (t @ p["wtp0"] + p["btp0"])) @ p["wl0"] + p["bl0"])
    h = jax.nn.silu((h + (t @ p["wtp1"] + p["btp1"])) @ p["wl1"] + p["bl1"])
    return h @ p["wo"] + p["bo"]


if __name__ == "__main__":
    key = jax.random.PRNGKey(0)
    kx, kt, kp = jax.random.split(key, 3)
    x = jax.random.normal(kx, (BATCH, FEATURE_DIM), jnp.float32)
    time = jax.random.uniform(kt, (BATCH,), jnp.float32, 0.0, 1000.0)
    params = _init_params(kp)

    packed = jax.tree_util.tree_map(jax.block_until_ready, prepare_params(params))

    out = jax.block_until_ready(time_conditioned_mlp(x, time, packed))
    ref = jax.block_until_ready(_reference(x, time, params))

    assert out.shape == (BATCH, FEATURE_DIM)
    # bf16 weight/activation dots vs f32 reference: intentional inference-precision trade-off.
    np.testing.assert_allclose(np.asarray(out), np.asarray(ref), rtol=2e-2, atol=2e-2)
    print("KERNEL_OK")
</pallas_src>

<mosaic_0001>
module attributes {stable_mosaic.version = 11 : i64} {
  func.func @_mlp_kernel(%arg0: memref<2x128xf32, #tpu.memory_space<vmem>>, %arg1: memref<128x1536xbf16, #tpu.memory_space<vmem>>, %arg2: memref<256x640xbf16, #tpu.memory_space<vmem>>, %arg3: memref<512x384xbf16, #tpu.memory_space<vmem>>, %arg4: memref<1x2688xf32, #tpu.memory_space<vmem>>, %arg5: memref<2x128xf32, #tpu.memory_space<vmem>>) attributes {dimension_semantics = [], scalar_prefetch = 0 : i64, scratch_operands = 0 : i64, tpu.core_type = #tpu.core_type<tc>} {
    %c0 = arith.constant 0 : index
    %c0_0 = arith.constant 0 : index
    %0 = vector.load %arg4[%c0, %c0_0] : memref<1x2688xf32, #tpu.memory_space<vmem>>, vector<1x128xf32>
    %c0_1 = arith.constant 0 : index
    %c128 = arith.constant 128 : index
    %1 = vector.load %arg4[%c0_1, %c128] : memref<1x2688xf32, #tpu.memory_space<vmem>>, vector<1x512xf32>
    %c0_2 = arith.constant 0 : index
    %c640 = arith.constant 640 : index
    %2 = vector.load %arg4[%c0_2, %c640] : memref<1x2688xf32, #tpu.memory_space<vmem>>, vector<1x128xf32>
    %c0_3 = arith.constant 0 : index
    %c768 = arith.constant 768 : index
    %3 = vector.load %arg4[%c0_3, %c768] : memref<1x2688xf32, #tpu.memory_space<vmem>>, vector<1x256xf32>
    %c0_4 = arith.constant 0 : index
    %c1024 = arith.constant 1024 : index
    %4 = vector.load %arg4[%c0_4, %c1024] : memref<1x2688xf32, #tpu.memory_space<vmem>>, vector<1x768xf32>
    %c0_5 = arith.constant 0 : index
    %c1792 = arith.constant 1792 : index
    %5 = vector.load %arg4[%c0_5, %c1792] : memref<1x2688xf32, #tpu.memory_space<vmem>>, vector<1x512xf32>
    %c0_6 = arith.constant 0 : index
    %c2304 = arith.constant 2304 : index
    %6 = vector.load %arg4[%c0_6, %c2304] : memref<1x2688xf32, #tpu.memory_space<vmem>>, vector<1x256xf32>
    %c0_7 = arith.constant 0 : index
    %c2560 = arith.constant 2560 : index
    %7 = vector.load %arg4[%c0_7, %c2560] : memref<1x2688xf32, #tpu.memory_space<vmem>>, vector<1x128xf32>
    %c0_8 = arith.constant 0 : index
    %c0_9 = arith.constant 0 : index
    %8 = vector.load %arg0[%c0_8, %c0_9] : memref<2x128xf32, #tpu.memory_space<vmem>>, vector<2x128xf32>
    %9 = vector.extract_strided_slice %8 {offsets = [0, 32], sizes = [2, 1], strides = [1, 1]} : vector<2x128xf32> to vector<2x1xf32>
    %10 = vector.broadcast %9 : vector<2x1xf32> to vector<2x128xf32>
    %11 = vector.broadcast %0 : vector<1x128xf32> to vector<2x128xf32>
    %12 = arith.mulf %10, %11 : vector<2x128xf32>
    %13 = tpu.iota {dimensions = array<i32: 1>} : vector<2x128xi32>
    %c64_i32 = arith.constant 64 : i32
    %14 = vector.broadcast %c64_i32 : i32 to vector<2x128xi32>
    %15 = arith.cmpi slt, %13, %14 : vector<2x128xi32>
    %16 = math.sin %12 : vector<2x128xf32>
    %17 = math.cos %12 : vector<2x128xf32>
    %18 = arith.select %15, %16, %17 : vector<2x128xi1>, vector<2x128xf32>
    %c0_10 = arith.constant 0 : index
    %c0_11 = arith.constant 0 : index
    %19 = vector.load %arg1[%c0_10, %c0_11] : memref<128x1536xbf16, #tpu.memory_space<vmem>>, vector<128x512xbf16>
    %20 = arith.truncf %18 : vector<2x128xf32> to vector<2x128xbf16>
    %cst = arith.constant dense<0.000000e+00> : vector<2x512xf32>
    %21 = tpu.matmul %20, %19, %cst {dimension_numbers = #tpu.dot_dimension_numbers<[1], [0], [0], [1], [0, 0, 1, 1], [], []>} : vector<2x128xbf16>, vector<128x512xbf16>, vector<2x512xf32> -> vector<2x512xf32>
    %22 = vector.broadcast %1 : vector<1x512xf32> to vector<2x512xf32>
    %23 = arith.addf %21, %22 : vector<2x512xf32>
    %24 = arith.negf %23 : vector<2x512xf32>
    %25 = math.exp %24 : vector<2x512xf32>
    %cst_12 = arith.constant 1.000000e+00 : f32
    %26 = vector.broadcast %cst_12 : f32 to vector<2x512xf32>
    %27 = arith.addf %26, %25 : vector<2x512xf32>
    %28 = arith.divf %26, %27 : vector<2x512xf32>
    %29 = arith.mulf %23, %28 : vector<2x512xf32>
    %c0_13 = arith.constant 0 : index
    %c0_14 = arith.constant 0 : index
    %30 = vector.load %arg3[%c0_13, %c0_14] : memref<512x384xbf16, #tpu.memory_space<vmem>>, vector<512x128xbf16>
    %31 = arith.truncf %29 : vector<2x512xf32> to vector<2x512xbf16>
    %cst_15 = arith.constant dense<0.000000e+00> : vector<2x128xf32>
    %32 = tpu.matmul %31, %30, %cst_15 {dimension_numbers = #tpu.dot_dimension_numbers<[1], [0], [0], [1], [0, 0, 1, 1], [], []>} : vector<2x512xbf16>, vector<512x128xbf16>, vector<2x128xf32> -> vector<2x128xf32>
    %33 = vector.broadcast %2 : vector<1x128xf32> to vector<2x128xf32>
    %34 = arith.addf %32, %33 : vector<2x128xf32>
    %c0_16 = arith.constant 0 : index
    %c1280 = arith.constant 1280 : index
    %35 = vector.load %arg1[%c0_16, %c1280] : memref<128x1536xbf16, #tpu.memory_space<vmem>>, vector<128x256xbf16>
    %36 = arith.truncf %8 : vector<2x128xf32> to vector<2x128xbf16>
    %cst_17 = arith.constant dense<0.000000e+00> : vector<2x256xf32>
    %37 = tpu.matmul %36, %35, %cst_17 {dimension_numbers = #tpu.dot_dimension_numbers<[1], [0], [0], [1], [0, 0, 1, 1], [], []>} : vector<2x128xbf16>, vector<128x256xbf16>, vector<2x256xf32> -> vector<2x256xf32>
    %38 = vector.broadcast %3 : vector<1x256xf32> to vector<2x256xf32>
    %39 = arith.addf %37, %38 : vector<2x256xf32>
    %40 = arith.negf %39 : vector<2x256xf32>
    %41 = math.exp %40 : vector<2x256xf32>
    %cst_18 = arith.constant 1.000000e+00 : f32
    %42 = vector.broadcast %cst_18 : f32 to vector<2x256xf32>
    %43 = arith.addf %42, %41 : vector<2x256xf32>
    %44 = arith.divf %42, %43 : vector<2x256xf32>
    %45 = arith.mulf %39, %44 : vector<2x256xf32>
    %c0_19 = arith.constant 0 : index
    %c512 = arith.constant 512 : index
    %46 = vector.load %arg1[%c0_19, %c512] : memref<128x1536xbf16, #tpu.memory_space<vmem>>, vector<128x768xbf16>
    %47 = arith.truncf %34 : vector<2x128xf32> to vector<2x128xbf16>
    %cst_20 = arith.constant dense<0.000000e+00> : vector<2x768xf32>
    %48 = tpu.matmul %47, %46, %cst_20 {dimension_numbers = #tpu.dot_dimension_numbers<[1], [0], [0], [1], [0, 0, 1, 1], [], []>} : vector<2x128xbf16>, vector<128x768xbf16>, vector<2x768xf32> -> vector<2x768xf32>
    %49 = vector.broadcast %4 : vector<1x768xf32> to vector<2x768xf32>
    %50 = arith.addf %48, %49 : vector<2x768xf32>
    %51 = vector.extract_strided_slice %50 {offsets = [0, 0], sizes = [2, 256], strides = [1, 1]} : vector<2x768xf32> to vector<2x256xf32>
    %52 = arith.addf %45, %51 : vector<2x256xf32>
    %c0_21 = arith.constant 0 : index
    %c0_22 = arith.constant 0 : index
    %53 = vector.load %arg2[%c0_21, %c0_22] : memref<256x640xbf16, #tpu.memory_space<vmem>>, vector<256x512xbf16>
    %54 = arith.truncf %52 : vector<2x256xf32> to vector<2x256xbf16>
    %cst_23 = arith.constant dense<0.000000e+00> : vector<2x512xf32>
    %55 = tpu.matmul %54, %53, %cst_23 {dimension_numbers = #tpu.dot_dimension_numbers<[1], [0], [0], [1], [0, 0, 1, 1], [], []>} : vector<2x256xbf16>, vector<256x512xbf16>, vector<2x512xf32> -> vector<2x512xf32>
    %56 = vector.broadcast %5 : vector<1x512xf32> to vector<2x512xf32>
    %57 = arith.addf %55, %56 : vector<2x512xf32>
    %58 = arith.negf %57 : vector<2x512xf32>
    %59 = math.exp %58 : vector<2x512xf32>
    %cst_24 = arith.constant 1.000000e+00 : f32
    %60 = vector.broadcast %cst_24 : f32 to vector<2x512xf32>
    %61 = arith.addf %60, %59 : vector<2x512xf32>
    %62 = arith.divf %60, %61 : vector<2x512xf32>
    %63 = arith.mulf %57, %62 : vector<2x512xf32>
    %64 = vector.extract_strided_slice %50 {offsets = [0, 256], sizes = [2, 512], strides = [1, 1]} : vector<2x768xf32> to vector<2x512xf32>
    %65 = arith.addf %63, %64 : vector<2x512xf32>
    %c0_25 = arith.constant 0 : index
    %c128_26 = arith.constant 128 : index
    %66 = vector.load %arg3[%c0_25, %c128_26] : memref<512x384xbf16, #tpu.memory_space<vmem>>, vector<512x256xbf16>
    %67 = arith.truncf %65 : vector<2x512xf32> to vector<2x512xbf16>
    %cst_27 = arith.constant dense<0.000000e+00> : vector<2x256xf32>
    %68 = tpu.matmul %67, %66, %cst_27 {dimension_numbers = #tpu.dot_dimension_numbers<[1], [0], [0], [1], [0, 0, 1, 1], [], []>} : vector<2x512xbf16>, vector<512x256xbf16>, vector<2x256xf32> -> vector<2x256xf32>
    %69 = vector.broadcast %6 : vector<1x256xf32> to vector<2x256xf32>
    %70 = arith.addf %68, %69 : vector<2x256xf32>
    %71 = arith.negf %70 : vector<2x256xf32>
    %72 = math.exp %71 : vector<2x256xf32>
    %cst_28 = arith.constant 1.000000e+00 : f32
    %73 = vector.broadcast %cst_28 : f32 to vector<2x256xf32>
    %74 = arith.addf %73, %72 : vector<2x256xf32>
    %75 = arith.divf %73, %74 : vector<2x256xf32>
    %76 = arith.mulf %70, %75 : vector<2x256xf32>
    %c0_29 = arith.constant 0 : index
    %c512_30 = arith.constant 512 : index
    %77 = vector.load %arg2[%c0_29, %c512_30] : memref<256x640xbf16, #tpu.memory_space<vmem>>, vector<256x128xbf16>
    %78 = arith.truncf %76 : vector<2x256xf32> to vector<2x256xbf16>
    %cst_31 = arith.constant dense<0.000000e+00> : vector<2x128xf32>
    %79 = tpu.matmul %78, %77, %cst_31 {dimension_numbers = #tpu.dot_dimension_numbers<[1], [0], [0], [1], [0, 0, 1, 1], [], []>} : vector<2x256xbf16>, vector<256x128xbf16>, vector<2x128xf32> -> vector<2x128xf32>
    %80 = vector.broadcast %7 : vector<1x128xf32> to vector<2x128xf32>
    %81 = arith.addf %79, %80 : vector<2x128xf32>
    %c0_32 = arith.constant 0 : index
    %c0_33 = arith.constant 0 : index
    %82 = vector.load %arg5[%c0_32, %c0_33] : memref<2x128xf32, #tpu.memory_space<vmem>>, vector<2x128xf32>
    tpu.vector_store %arg5[%c0_32, %c0_33], %81 {strides = array<i32>} : memref<2x128xf32, #tpu.memory_space<vmem>>, vector<2x128xf32>,
    return
  }
}

</mosaic_0001>

<bundles_post_ra>
// kernel: tpu_custom_call.1
= control target key start
LH: loop header
LB: loop body
LE: loop exit
PB: predicated region body
PF: predicated region fallthrough
CT: control target
= control target key end

     0   :  { %10 = vsyncpa [#allocation3], 0  ;;  %s4001_s0 = inlined_call_operand.hbm [shape: f32[2,128], index: 0, kind: input, shape index: {}]   ;;  %s4002_s1 = inlined_call_operand.hbm [shape: bf16[128,1536], index: 1, kind: input, shape index: {}]   ;;  %s4003_s2 = inlined_call_operand.hbm [shape: bf16[256,640], index: 2, kind: input, shape index: {}]   ;;  %s4004_s3 = inlined_call_operand.hbm [shape: bf16[512,384], index: 3, kind: input, shape index: {}]   ;;  %s4005_s4 = inlined_call_operand.hbm [shape: f32[1,2688], index: 4, kind: input, shape index: {}]   ;;  %s4006_s5 = inlined_call_operand.hbm [shape: f32[2,128], index: 5, kind: output, shape index: {}]  }
   0x1   :  { %11 = vsyncpa [#allocation6], 0 }
   0x2   :  { %12 = vsyncpa [#allocation9], 0 }
   0x3   :  { %13 = vsyncpa [#allocation4], 0  ;;  %s3775_s18 = smov [#allocation5]   ;;  %s3635_s22 = scalar_lea.hbm %s4002_s1, 12288 }
   0x4   :  { %s29_s19 = sshll.u32 %s3775_s18, 4  ;;  %p3636_p0 = scmp.ne.s32.totalorder %s4002_s1, %s3635_s22  ;;  %s30_s19 = int_to_ptr.vmem [resolvable:$true] %s29_s19 }
   0x5   :  { %p3639_p1 = scmp.lt.u32.totalorder %s3635_s22, %s4002_s1 }
   0x7   :  { %p3641_p2 = pnand %p3639_p1, %p3636_p0 }
   0x9   :  { %3644 = shalt.err (!%p3641_p2)
}
   0xa   :  { %s3645_s27 = scalar_lea.vmem %s30_s19, 12288  ;;  %p3650_p4 = scmp.lt.s32.totalorder %s30_s19, %s30_s19 }
   0xb   :  { %p3646_p3 = scmp.ne.s32.totalorder %s30_s19, %s3645_s27  ;;  %p3651_p5 = scmp.lt.s32.totalorder %s3645_s27, %s3645_s27 }
   0xd   :  { %p3652_p6 = por %p3651_p5, %p3650_p4 }
   0xf   :  { %p3653_p7 = pnand %p3652_p6, %p3646_p3 }
  0x11   :  { %3656 = shalt.err (!%p3653_p7)
}
  0x12   :  { %s3776_s28 = smov 768   ;;  %s3777_s29 = smov 48  }
  0x13   :  { %35 = dma.hbm_to_vmem [thread:$0]  %s4002_s1, 12288, %s30_s19, [#allocation6], %s3776_s28, %s3776_s28, %s3777_s29  }
  0x14   :  { %s3778_s7 = smov [#allocation8]   ;;  %s3657_s11 = scalar_lea.hbm %s4004_s3, 12288 }
  0x15   :  { %s53_s8 = sshll.u32 %s3778_s7, 4  ;;  %p3658_p8 = scmp.ne.s32.totalorder %s4004_s3, %s3657_s11  ;;  %s54_s8 = int_to_ptr.vmem [resolvable:$true] %s53_s8 }
  0x16   :  { %p3661_p9 = scmp.lt.u32.totalorder %s3657_s11, %s4004_s3 }
  0x18   :  { %p3663_p10 = pnand %p3661_p9, %p3658_p8 }
  0x1a   :  { %3666 = shalt.err (!%p3663_p10)
}
  0x1b   :  { %s3667_s16 = scalar_lea.vmem %s54_s8, 12288  ;;  %p3672_p12 = scmp.lt.s32.totalorder %s54_s8, %s54_s8 }
  0x1c   :  { %p3668_p11 = scmp.ne.s32.totalorder %s54_s8, %s3667_s16  ;;  %p3673_p13 = scmp.lt.s32.totalorder %s3667_s16, %s3667_s16 }
  0x1e   :  { %p3674_p0 = por %p3673_p13, %p3672_p12 }
  0x20   :  { %p3675_p1 = pnand %p3674_p0, %p3668_p11 }
  0x22   :  { %3678 = shalt.err (!%p3675_p1)
}
  0x23   :  { %s3779_s1 = smov 192   ;;  %s3780_s17 = smov 12  }
  0x24   :  { %59 = dma.hbm_to_vmem [thread:$0]  %s4004_s3, 12288, %s54_s8, [#allocation9], %s3779_s1, %s3779_s1, %s3780_s17  }
  0x25   :  { %s3781_s20 = smov [#allocation2]   ;;  %s3782_s22 = smov [#allocation7]  }
  0x26   :  { %s20_s21 = sshll.u32 %s3781_s20, 4  ;;  %s41_s23 = sshll.u32 %s3782_s22, 4  ;;  %s21_s21 = int_to_ptr.vmem [resolvable:$true] %s20_s21  ;;  %s3849_s23 = int_to_ptr.vmem [resolvable:$true] %s41_s23 }
  0x27   :  { %s3679_s26 = scalar_lea.hbm %s4001_s0, 32 }
  0x28   :  { %p3680_p2 = scmp.ne.s32.totalorder %s4001_s0, %s3679_s26  ;;  %p3683_p3 = scmp.lt.u32.totalorder %s3679_s26, %s4001_s0 }
  0x2a   :  { %p3685_p4 = pnand %p3683_p3, %p3680_p2 }
  0x2c   :  { %3688 = shalt.err (!%p3685_p4)
}
  0x2d   :  { %s3689_s3 = scalar_lea.vmem %s21_s21, 32  ;;  %p3694_p6 = scmp.lt.s32.totalorder %s21_s21, %s21_s21 }
  0x2e   :  { %p3690_p5 = scmp.ne.s32.totalorder %s21_s21, %s3689_s3  ;;  %p3695_p7 = scmp.lt.s32.totalorder %s3689_s3, %s3689_s3 }
  0x30   :  { %p3696_p8 = por %p3695_p7, %p3694_p6 }
  0x32   :  { %p3697_p9 = pnand %p3696_p8, %p3690_p5 }
  0x34   :  { %3700 = shalt.err (!%p3697_p9)
}
  0x35   :  { %23 = dma.hbm_to_vmem [thread:$0]  %s4001_s0, 32, %s21_s21, [#allocation3]  }
  0x36   :  { %s3701_s10 = scalar_lea.hbm %s4003_s2, 10240 }
  0x37   :  { %p3702_p10 = scmp.ne.s32.totalorder %s4003_s2, %s3701_s10  ;;  %p3705_p11 = scmp.lt.u32.totalorder %s3701_s10, %s4003_s2 }
  0x39   :  { %p3707_p12 = pnand %p3705_p11, %p3702_p10 }
  0x3b   :  { %3710 = shalt.err (!%p3707_p12)
}
  0x3c   :  { %s3711_s15 = scalar_lea.vmem %s3849_s23, 10240  ;;  %p3716_p0 = scmp.lt.s32.totalorder %s3849_s23, %s3849_s23 }
  0x3d   :  { %p3712_p13 = scmp.ne.s32.totalorder %s3849_s23, %s3711_s15  ;;  %p3717_p1 = scmp.lt.s32.totalorder %s3711_s15, %s3711_s15 }
  0x3f   :  { %p3718_p2 = por %p3717_p1, %p3716_p0 }
  0x41   :  { %p3719_p3 = pnand %p3718_p2, %p3712_p13 }
  0x43   :  { %3722 = shalt.err (!%p3719_p3)
}
  0x44   :  { %s3783_s0 = smov 320   ;;  %s3784_s16 = smov 20  }
  0x45   :  { %47 = dma.hbm_to_vmem [thread:$0]  %s4003_s2, 10240, %s3849_s23, [#allocation6], %s3783_s0, %s3783_s0, %s3784_s16  }
  0x46   :  { %s3785_s18 = smov [#allocation10]   ;;  %s3723_s22 = scalar_lea.hbm %s4005_s4, 336 }
  0x47   :  { %s66_s19 = sshll.u32 %s3785_s18, 4  ;;  %p3724_p4 = scmp.ne.s32.totalorder %s4005_s4, %s3723_s22  ;;  %s67_s19 = int_to_ptr.vmem [resolvable:$true] %s66_s19 }
  0x48   :  { %p3727_p5 = scmp.lt.u32.totalorder %s3723_s22, %s4005_s4 }
  0x4a   :  { %p3729_p6 = pnand %p3727_p5, %p3724_p4 }
  0x4c   :  { %3732 = shalt.err (!%p3729_p6)
}
  0x4d   :  { %s3733_s28 = scalar_lea.vmem %s67_s19, 336  ;;  %s3737_s2 = scalar_lea.vmem %s67_s19, 352 }
  0x4e   :  { %p3734_p7 = scmp.ne.s32.totalorder %s67_s19, %s3733_s28  ;;  %p3738_p8 = scmp.lt.s32.totalorder %s67_s19, %s67_s19 }
  0x4f   :  { %p3739_p9 = scmp.lt.s32.totalorder %s3737_s2, %s3733_s28 }
  0x51   :  { %p3740_p10 = por %p3739_p9, %p3738_p8 }
  0x53   :  { %p3741_p11 = pnand %p3740_p10, %p3734_p7 }
  0x55   :  { %3744 = shalt.err (!%p3741_p11)
}
  0x56   :  { %69 = dma.hbm_to_vmem [thread:$0]  %s4005_s4, 336, %s67_s19, [#allocation9]  }
  0x57   :  { %3767 = dma.done.wait [#allocation3], 32  }
  0x58   :  { %3768 = vsyncadd [#allocation3], 4294967264 }
  0x59   :  { %3769 = dma.done.wait [#allocation6], 22528  }
  0x5a   :  { %3770 = vsyncadd [#allocation6], 4294944768 }
  0x5b   :  { %3771 = dma.done.wait [#allocation9], 12624  }
  0x5c   :  { %3772 = vsyncadd [#allocation9], 4294954672  ;;  %v3786_v0 = vmov 32   ;;  %v94_v1 = vld [vmem:[#allocation2] sm:$0x3]  ;;  %v3787_v15 = vmov 0  }
  0x5d   :  { %3197 = vset.pattern.permute.xlu0 %v3786_v0  ;;  %v3198_v2 = vld [vmem:[#allocation5 + $0x4] ss:$48 sps:$4 sm:$0xff]   ;;  %v3200_v3 = vld [vmem:[#allocation5] ss:$48 sps:$4 sm:$0xff]   ;;  %564 = vmatprep.mubr.bf16.mxu1 %v3787_v15  ;;  %v3224_v19 = vld [vmem:[#allocation5 + $0xc] ss:$48 sps:$4 sm:$0xff]  }
  0x5e   :  { %97 = vperm.xlu0 %3197, %v94_v1   ;;  %532 = vmatprep.subr.bf16.mxu1 %v3198_v2  ;;  %v3201_v4 = vld [vmem:[#allocation5 + $0x64] ss:$48 sps:$4 sm:$0xff]   ;;  %v3203_v5 = vld [vmem:[#allocation5 + $0x60] ss:$48 sps:$4 sm:$0xff]   ;;  %v3788_v33 = vmov 683565275  }
  0x5f   :  { %533 = vmatpush1.bf16.msra.mxu1 %v3200_v3  ;;  %v3204_v6 = vld [vmem:[#allocation5 + $0xc4] ss:$48 sps:$4 sm:$0xff]   ;;  %v3206_v7 = vld [vmem:[#allocation5 + $0xc0] ss:$48 sps:$4 sm:$0xff]   ;;  %v3789_v35 = vmov 2475754826  }
  0x60   :  { %534 = vmatprep.subr.bf16.mxu1 %v3201_v4  ;;  %v3207_v8 = vld [vmem:[#allocation5 + $0x124] ss:$48 sps:$4 sm:$0xff]   ;;  %v3209_v9 = vld [vmem:[#allocation5 + $0x120] ss:$48 sps:$4 sm:$0xff]   ;;  %v3790_v38 = vmov 2131351028  }
  0x61   :  { %v3210_v10 = vld [vmem:[#allocation5 + $0x184] ss:$48 sps:$4 sm:$0xff]   ;;  %v3212_v11 = vld [vmem:[#allocation5 + $0x180] ss:$48 sps:$4 sm:$0xff]   ;;  %v3791_v41 = vmov 2102212464  }
  0x62   :  { %v3213_v12 = vld [vmem:[#allocation5 + $0x1e4] ss:$48 sps:$4 sm:$0xff]   ;;  %v3215_v13 = vld [vmem:[#allocation5 + $0x1e0] ss:$48 sps:$4 sm:$0xff]   ;;  %v3792_v44 = vmov 920167782  }
  0x63   :  { %535 = vmatpush1.bf16.msra.mxu1 %v3203_v5  ;;  %v3216_v14 = vld [vmem:[#allocation5 + $0x244] ss:$48 sps:$4 sm:$0xff]   ;;  %v3218_v16 = vld [vmem:[#allocation5 + $0x240] ss:$48 sps:$4 sm:$0xff]   ;;  %v3793_v47 = vmov 1326507024  }
  0x64   :  { %536 = vmatprep.subr.bf16.mxu1 %v3204_v6  ;;  %v3219_v17 = vld [vmem:[#allocation5 + $0x2a4] ss:$48 sps:$4 sm:$0xff]   ;;  %v3221_v18 = vld [vmem:[#allocation5 + $0x2a0] ss:$48 sps:$4 sm:$0xff]   ;;  %s3794_s4 = smov [#allocation11]  }
  0x65   :  { %v2806_v20 = vld [vmem:[#allocation10] ss:$0 sm:$0xff]  ;;  %s2795_s30 = sshll.u32 %s3794_s4, 4  ;;  %s2796_s30 = int_to_ptr.vmem [resolvable:$true] %s2795_s30 }
  0x66   :  { %s3745_s3 = scalar_lea.vmem %s2796_s30, 32  ;;  %p3750_p13 = scmp.lt.s32.totalorder %s2796_s30, %s2796_s30 }
  0x67   :  { %537 = vmatpush1.bf16.msra.mxu1 %v3206_v7  ;;  %p3746_p12 = scmp.ne.s32.totalorder %s2796_s30, %s3745_s3  ;;  %p3751_p0 = scmp.lt.s32.totalorder %s3745_s3, %s3745_s3 }
  0x68   :  { %538 = vmatprep.subr.bf16.mxu1 %v3207_v8 }
  0x69   :  { %p3752_p1 = por %p3751_p0, %p3750_p13 }
  0x6b   :  { %539 = vmatpush1.bf16.msra.mxu1 %v3209_v9  ;;  %p3753_p2 = pnand %p3752_p1, %p3746_p12 }
  0x6c   :  { %540 = vmatprep.subr.bf16.mxu1 %v3210_v10 }
  0x6f   :  { %541 = vmatpush1.bf16.msra.mxu1 %v3212_v11 }
  0x70   :  { %542 = vmatprep.subr.bf16.mxu1 %v3213_v12 }
  0x73   :  { %543 = vmatpush1.bf16.msra.mxu1 %v3215_v13 }
  0x74   :  { %544 = vmatprep.subr.bf16.mxu1 %v3216_v14 }
  0x77   :  { %545 = vmatpush1.bf16.msra.mxu1 %v3218_v16 }
  0x78   :  { %546 = vmatprep.subr.bf16.mxu1 %v3219_v17 }
  0x7b   :  { %547 = vmatpush1.bf16.msra.mxu1 %v3221_v18 }
  0x7c   :  { %573 = vmatprep.subr.bf16.mxu1 %v3224_v19 }
  0xdd   :  { %v98_v21 = vpop.permute.xlu0 %97 }
  0xde   :  { %v3893_v22 = vmul.f32 %v2806_v20, %v98_v21 }
  0xe0   :  { %v113_v23 = vand.u32 2139095040, %v3893_v22  ;;  %v110_v27 = vand.u32 2147483647, %v3893_v22  ;;  %vm112_vm7 = vcmp.lt.s32.totalorder %v3893_v22, 0 }
  0xe2   :  { %v114_v24 = vshrl.u32 %v113_v23, 23  ;;  %v117_v30 = vand.u32 8388607, %v110_v27  ;;  %vm111_vm8 = vcmp.le.f32.partialorder %v110_v27, 0.7853982 }
  0xe4   :  { %v2807_v25 = vadd.s32 4294967169, %v114_v24  ;;  %v118_v49 = vor.u32 8388608, %v117_v30 }
  0xe6   :  { %v120_v26 = vadd.s32 1, %v2807_v25  ;;  %v158_v63 = vshll.u32 %v118_v49, 8 }
  0xe8   :  { %vm121_vm0 = vcmp.gt.s32.totalorder %v120_v26, 0 }
  0xe9   :  { %v122_v28 = vsel %vm121_vm0, %v120_v26, 0  ;;  %vm202_vm0 = vweird.f32 %v3893_v22 }
  0xea   :  { %v124_v29 = vand.u32 31, %v122_v28  ;;  %v123_v32 = vshrl.u32 %v122_v28, 5 }
  0xec   :  { %v125_v31 = vsub.s32 32, %v124_v29  ;;  %v127_v34 = vshll.u32 %v3788_v33, %v124_v29  ;;  %v130_v36 = vshll.u32 %v3789_v35, %v124_v29  ;;  %v133_v40 = vshll.u32 %v3790_v38, %v124_v29 }
  0xed   :  { %v136_v43 = vshll.u32 %v3791_v41, %v124_v29  ;;  %v139_v46 = vshll.u32 %v3792_v44, %v124_v29  ;;  %vm142_vm1 = vcmp.lt.s32.totalorder %v123_v32, 1  ;;  %vm145_vm2 = vcmp.lt.s32.totalorder %v123_v32, 4 }
  0xee   :  { %v128_v37 = vshrl.u32 %v3789_v35, %v125_v31  ;;  %v131_v39 = vshrl.u32 %v3790_v38, %v125_v31  ;;  %v134_v42 = vshrl.u32 %v3791_v41, %v125_v31  ;;  %v137_v45 = vshrl.u32 %v3792_v44, %v125_v31 }
  0xef   :  { %v140_v48 = vshrl.u32 %v3793_v47, %v125_v31  ;;  %v126_v58 = vshrl.u32 %v3788_v33, %v125_v31  ;;  %vm144_vm3 = vcmp.lt.s32.totalorder %v123_v32, 3  ;;  %vm143_vm4 = vcmp.lt.s32.totalorder %v123_v32, 2 }
  0xf0   :  { %v129_v50 = vor.u32 %v128_v37, %v127_v34  ;;  %v132_v51 = vor.u32 %v131_v39, %v130_v36  ;;  %v135_v52 = vor.u32 %v134_v42, %v133_v40  ;;  %v138_v53 = vor.u32 %v137_v45, %v136_v43 }
  0xf1   :  { %v141_v54 = vor.u32 %v140_v48, %v139_v46  ;;  %v107_v43 = vlaneseq }
  0xf2   :  { %v147_v55 = vsel %vm145_vm2, %v135_v52, 2102212464  ;;  %v150_v56 = vsel %vm142_vm1, %v129_v50, %v132_v51  ;;  %v154_v57 = vsel %vm142_vm1, %v132_v51, %v135_v52  ;;  %v151_v59 = vsel %vm145_vm2, %v138_v53, 920167782 }
  0xf3   :  { %v155_v60 = vsel %vm145_vm2, %v141_v54, 1326507024  ;;  %v152_v61 = vsel %vm144_vm3, %v135_v52, %v151_v59  ;;  %v146_v0 = vsel %vm142_vm1, %v126_v58, %v129_v50  ;;  %v148_v1 = vsel %vm144_vm3, %v132_v51, %v147_v55  ;;  %v3222_v59 = vld [vmem:[#allocation5 + $0x8] ss:$48 sps:$4 sm:$0xff]  }
  0xf4   :  { %v156_v62 = vsel %vm144_vm3, %v138_v53, %v155_v60  ;;  %v153_v2 = vsel %vm143_vm4, %v150_v56, %v152_v61  ;;  %v149_v8 = vsel %vm143_vm4, %v146_v0, %v148_v1  ;;  %v108_v45 = vand.u32 127, %v107_v43  ;;  %v3230_v0 = vld [vmem:[#allocation5 + $0xcc] ss:$48 sps:$4 sm:$0xff]   ;;  %v3228_v1 = vld [vmem:[#allocation5 + $0xc8] ss:$48 sps:$4 sm:$0xff]  }
  0xf5   :  { %v157_v3 = vsel %vm143_vm4, %v154_v57, %v156_v62  ;;  %v3902_v6 = vmul.u32.u64.low %v158_v63, %v153_v2  ;;  %v3903_v7 = vmul.u32.u64.high %v158_v63, %v153_v2, %v3902_v6  ;;  %v165_v10 = vmul.u32 %v158_v63, %v149_v8  ;;  %v3227_v62 = vld [vmem:[#allocation5 + $0x6c] ss:$48 sps:$4 sm:$0xff]   ;;  %v3231_v2 = vld [vmem:[#allocation5 + $0x128] ss:$48 sps:$4 sm:$0xff]  }
  0xf6   :  { %v3899_v4 = vmul.u32.u64.low %v158_v63, %v157_v3  ;;  %v3900_v5 = vmul.u32.u64.high %v158_v63, %v157_v3, %v3899_v4  ;;  %vm109_vm9 = vcmp.lt.s32.totalorder %v108_v45, 64  ;;  %v3225_v63 = vld [vmem:[#allocation5 + $0x68] ss:$48 sps:$4 sm:$0xff]   ;;  %v3236_v3 = vld [vmem:[#allocation5 + $0x18c] ss:$48 sps:$4 sm:$0xff]  }
  0xf7   :  { %v168_v9 = vadd.s32 1, %v3903_v7  ;;  %v3234_v4 = vld [vmem:[#allocation5 + $0x188] ss:$48 sps:$4 sm:$0xff]  }
  0xf8   :  { %vm167_vm5 = vc.u32 %v3900_v5, %v3902_v6  ;;  %v166_v24 = vadd.s32 %v3902_v6, %v3900_v5  ;;  %v3239_v5 = vld [vmem:[#allocation5 + $0x1ec] ss:$48 sps:$4 sm:$0xff]   ;;  %v3237_v6 = vld [vmem:[#allocation5 + $0x1e8] ss:$48 sps:$4 sm:$0xff]  }
  0xf9   :  { %v169_v11 = vsel %vm167_vm5, %v168_v9, %v3903_v7  ;;  %v3242_v7 = vld [vmem:[#allocation5 + $0x24c] ss:$48 sps:$4 sm:$0xff]   ;;  %v3240_v8 = vld [vmem:[#allocation5 + $0x248] ss:$48 sps:$4 sm:$0xff]  }
  0xfa   :  { %v170_v12 = vadd.s32 %v169_v11, %v165_v10  ;;  %v3245_v9 = vld [vmem:[#allocation5 + $0x2ac] ss:$48 sps:$4 sm:$0xff]   ;;  %v3243_v10 = vld [vmem:[#allocation5 + $0x2a8] ss:$48 sps:$4 sm:$0xff]  }
  0xfb   :  { %v3246_v11 = vld [vmem:[#allocation8 + $0xc0] ss:$12 sps:$4 sm:$0xff]   ;;  %v3276_v45 = vld [vmem:[#allocation8 + $0x2e8] ss:$12 sps:$4 sm:$0xff]  }
  0xfc   :  { %v171_v13 = vadd.s32 536870912, %v170_v12  ;;  %3101 = vmatprep.subr.bf16.mxu0 %v3246_v11 }
  0xfe   :  { %v172_v14 = vshrl.u32 %v171_v13, 30  ;;  %v3248_v13 = vld [vmem:[#allocation8 + $0xd8] ss:$12 sps:$4 sm:$0xff]  }
 0x100   :  { %v173_v16 = vshll.u32 %v172_v14, 30  ;;  %v196_v37 = vsub.s32 4, %v172_v14 }
 0x102   :  { %v174_v17 = vsub.s32 %v170_v12, %v173_v16  ;;  %v197_v40 = vsel %vm112_vm7, %v196_v37, %v172_v14  ;;  %v3247_v12 = vld [vmem:[#allocation8] ss:$12 sps:$4 sm:$0xff]   ;;  %v3249_v14 = vld [vmem:[#allocation8 + $0x18] ss:$12 sps:$4 sm:$0xff]   ;;  %v3250_v16 = vld [vmem:[#allocation8 + $0xf0] ss:$12 sps:$4 sm:$0xff]  }
 0x103   :  { %v199_v42 = vsel %vm111_vm8, 0, %v197_v40  ;;  %3102 = vmatpush3.bf16.msra.mxu0 %v3247_v12  ;;  %v3269_v37 = vld [vmem:[#allocation8 + $0x1c8] ss:$12 sps:$4 sm:$0xff]   ;;  %v3272_v40 = vld [vmem:[#allocation8 + $0x2b8] ss:$12 sps:$4 sm:$0xff]  }
 0x104   :  { %v176_v18 = vsub.s32 0, %v174_v17  ;;  %v203_v44 = vadd.s32 3, %v199_v42  ;;  %v307_v47 = vand.u32 3, %v199_v42  ;;  %3103 = vmatprep.subr.bf16.mxu0 %v3248_v13  ;;  %v3274_v42 = vld [vmem:[#allocation8 + $0x2d0] ss:$12 sps:$4 sm:$0xff]  }
 0x105   :  { %v3283_v13 = vld [vmem:[#allocation5 + $0x8c] ss:$48 sps:$4 sm:$0xff]  }
 0x106   :  { %v2808_v19 = vmin.u32 %v176_v18, %v174_v17  ;;  %v204_v46 = vand.u32 3, %v203_v44  ;;  %vm312_vm11 = vcmp.eq.s32.totalorder %v307_v47, 2  ;;  %vm309_vm13 = vcmp.eq.s32.totalorder %v307_v47, 0  ;;  %v3252_v18 = vld [vmem:[#allocation8 + $0x108] ss:$12 sps:$4 sm:$0xff]  }
 0x107   :  { %vm308_vm15 = vcmp.lt.s32.totalorder %v307_v47, 2  ;;  %3104 = vmatpush3.bf16.msra.mxu0 %v3249_v14  ;;  %v3275_v44 = vld [vmem:[#allocation8 + $0x210] ss:$12 sps:$4 sm:$0xff]  }
 0x108   :  { %v178_v20 = vclz %v2808_v19  ;;  %vm209_vm10 = vcmp.eq.s32.totalorder %v204_v46, 2  ;;  %vm206_vm12 = vcmp.eq.s32.totalorder %v204_v46, 0  ;;  %vm205_vm14 = vcmp.lt.s32.totalorder %v204_v46, 2  ;;  %3105 = vmatprep.subr.bf16.mxu0 %v3250_v16  ;;  %v3253_v19 = vld [vmem:[#allocation8 + $0x48] ss:$12 sps:$4 sm:$0xff]  }
 0x109   :  { %v3277_v46 = vld [vmem:[#allocation8 + $0x228] ss:$12 sps:$4 sm:$0xff]   ;;  %v3280_v47 = vld [vmem:[#allocation5 + $0x2c] ss:$48 sps:$4 sm:$0xff]  }
 0x10a   :  { %v2809_v21 = vadd.s32 4294967294, %v178_v20  ;;  %v3254_v20 = vld [vmem:[#allocation8 + $0x120] ss:$12 sps:$4 sm:$0xff]  }
 0x10c   :  { %vm2810_vm6 = vcmp.lt.s32.totalorder %v2809_v21, 0 }
 0x10d   :  { %v181_v23 = vsel %vm2810_vm6, 0, %v2809_v21  ;;  %v3255_v21 = vld [vmem:[#allocation8 + $0x60] ss:$12 sps:$4 sm:$0xff]  }
 0x10e   :  { %v182_v25 = vsub.s32 32, %v181_v23  ;;  %v186_v26 = vsub.s32 4294967266, %v181_v23  ;;  %v183_v28 = vshll.u32 %v174_v17, %v181_v23  ;;  %v3251_v17 = vld [vmem:[#allocation8 + $0x30] ss:$12 sps:$4 sm:$0xff]   ;;  %v3256_v23 = vld [vmem:[#allocation8 + $0x138] ss:$12 sps:$4 sm:$0xff]  }
 0x10f   :  { %3106 = vmatpush3.bf16.msra.mxu0 %v3251_v17 }
 0x110   :  { %v184_v29 = vshrl.u32 %v166_v24, %v182_v25  ;;  %v187_v30 = vadd.s32 127, %v186_v26  ;;  %3107 = vmatprep.subr.bf16.mxu0 %v3252_v18  ;;  %v3257_v24 = vld [vmem:[#allocation8 + $0x78] ss:$12 sps:$4 sm:$0xff]   ;;  %v3258_v25 = vld [vmem:[#allocation8 + $0x150] ss:$12 sps:$4 sm:$0xff]  }
 0x111   :  { %v3259_v26 = vld [vmem:[#allocation8 + $0x90] ss:$12 sps:$4 sm:$0xff]  }
 0x112   :  { %v185_v31 = vor.u32 %v184_v29, %v183_v28  ;;  %v188_v32 = vshll.u32 %v187_v30, 23  ;;  %v3260_v28 = vld [vmem:[#allocation8 + $0x168] ss:$12 sps:$4 sm:$0xff]   ;;  %v3262_v30 = vld [vmem:[#allocation8 + $0x240] ss:$12 sps:$4 sm:$0xff]  }
 0x113   :  { %3108 = vmatpush3.bf16.msra.mxu0 %v3253_v19  ;;  %v3261_v29 = vld [vmem:[#allocation8 + $0xa8] ss:$12 sps:$4 sm:$0xff]  }
 0x114   :  { %v189_v33 = vor.u32 4788187, %v188_v32  ;;  %v192_v35 = vcvt.s32.f32 %v185_v31  ;;  %3109 = vmatprep.subr.bf16.mxu0 %v3254_v20  ;;  %v3263_v31 = vld [vmem:[#allocation8 + $0x180] ss:$12 sps:$4 sm:$0xff]   ;;  %v3264_v32 = vld [vmem:[#allocation8 + $0x258] ss:$12 sps:$4 sm:$0xff]  }
 0x115   :  { %v3281_v20 = vld [vmem:[#allocation5 + $0x88] ss:$48 sps:$4 sm:$0xff]  }
 0x116   :  { %v190_v34 = vand.u32 2147483647, %v189_v33  ;;  %v3265_v33 = vld [vmem:[#allocation8 + $0x198] ss:$12 sps:$4 sm:$0xff]  }
 0x117   :  { %3110 = vmatpush3.bf16.msra.mxu0 %v3255_v21  ;;  %v3286_v21 = vld [vmem:[#allocation5 + $0xec] ss:$48 sps:$4 sm:$0xff]  }
 0x118   :  { %v193_v36 = vmul.f32 %v192_v35, %v190_v34  ;;  %3111 = vmatprep.subr.bf16.mxu0 %v3256_v23  ;;  %v3266_v34 = vld [vmem:[#allocation8 + $0x270] ss:$12 sps:$4 sm:$0xff]   ;;  %v3284_v23 = vld [vmem:[#allocation5 + $0xe8] ss:$48 sps:$4 sm:$0xff]  }
 0x119   :  { %v3267_v35 = vld [vmem:[#allocation8 + $0x1b0] ss:$12 sps:$4 sm:$0xff]  }
 0x11a   :  { %v194_v38 = vxor.u32 2147483648, %v193_v36 }
 0x11b   :  { %3112 = vmatpush3.bf16.msra.mxu0 %v3257_v24  ;;  %v3289_v24 = vld [vmem:[#allocation5 + $0x14c] ss:$48 sps:$4 sm:$0xff]  }
 0x11c   :  { %v195_v39 = vsel %vm112_vm7, %v194_v38, %v193_v36  ;;  %3113 = vmatprep.subr.bf16.mxu0 %v3258_v25  ;;  %v3268_v36 = vld [vmem:[#allocation8 + $0x288] ss:$12 sps:$4 sm:$0xff]   ;;  %v3270_v38 = vld [vmem:[#allocation8 + $0x2a0] ss:$12 sps:$4 sm:$0xff]  }
 0x11d   :  { %v198_v41 = vsel %vm111_vm8, %v3893_v22, %v195_v39  ;;  %v3233_v22 = vld [vmem:[#allocation5 + $0x12c] ss:$48 sps:$4 sm:$0xff]   ;;  %v3287_v25 = vld [vmem:[#allocation5 + $0x148] ss:$48 sps:$4 sm:$0xff]  }
 0x11e   :  { %3582 = vcosq.f32 %v198_v41  ;;  %v3271_v39 = vld [vmem:[#allocation8 + $0x1e0] ss:$12 sps:$4 sm:$0xff]  }
 0x11f   :  { %3584 = vsinq.f32 %v198_v41  ;;  %3114 = vmatpush3.bf16.msra.mxu0 %v3259_v26  ;;  %v3273_v41 = vld [vmem:[#allocation8 + $0x1f8] ss:$12 sps:$4 sm:$0xff]   ;;  %v3292_v26 = vld [vmem:[#allocation5 + $0x1ac] ss:$48 sps:$4 sm:$0xff]  }
 0x120   :  { %3115 = vmatprep.subr.bf16.mxu0 %v3260_v28 }
 0x123   :  { %3116 = vmatpush3.bf16.msra.mxu0 %v3261_v29 }
 0x124   :  { %1096 = vmatprep.subr.bf16.mxu0 %v3280_v47 }
 0x128   :  { %v3583_v48 = vpop.eup %3582 }
 0x129   :  { %v3585_v49 = vpop.eup %3584  ;;  %v210_v50 = vxor.u32 2147483648, %v3583_v48 }
 0x12a   :  { %v207_v51 = vxor.u32 2147483648, %v3585_v49 }
 0x12b   :  { %v211_v27 = vsel %vm209_vm10, %v210_v50, %v3585_v49  ;;  %v314_v52 = vsel %vm312_vm11, %v210_v50, %v3585_v49  ;;  %v87_v50 = vld [vmem:[#allocation10 + $0x1] sm:$0xf] }
 0x12c   :  { %v208_v53 = vsel %vm206_vm12, %v3583_v48, %v207_v51  ;;  %v311_v54 = vsel %vm309_vm13, %v3583_v48, %v207_v51  ;;  %v3918_v48 = vshrl.u32 %v107_v43, 7 }
 0x12d   :  { %v212_v55 = vsel %vm205_vm14, %v208_v53, %v211_v27  ;;  %v315_v56 = vsel %vm308_vm15, %v311_v54, %v314_v52 }
 0x12e   :  { %v213_v57 = vsel %vm202_vm0, nan, %v212_v55  ;;  %v316_v58 = vsel %vm202_vm0, nan, %v315_v56  ;;  %v3921_v49 = vsub.s32 0, %v3918_v48  ;;  %v3924_v51 = vsub.s32 1, %v3918_v48 }
 0x12f   :  { %v317_v60 = vsel %vm109_vm9, %v213_v57, %v316_v58 }
 0x130   :  { %v350_v61 = vpack.c.bf16 %v317_v60, %v317_v60  ;;  %v355_v27 = vrot.slane %v87_v50, %v3921_v49  ;;  %v359_v52 = vrot.slane %v87_v50, %v3924_v51 }
 0x132   :  { %565 = vmatmul.mubr.bf16.vlgmr.msra.gmra.mrb[0].mxu1 %v350_v61 }
 0x133   :  { %574 = vmatpush1.bf16.msra.mxu1 %v3222_v59  ;;  %605 = vmatprep.mubr.bf16.mxu1 %v3787_v15 }
 0x134   :  { %575 = vmatprep.subr.bf16.mxu1 %v3227_v62 }
 0x137   :  { %576 = vmatpush1.bf16.msra.mxu1 %v3225_v63 }
 0x138   :  { %577 = vmatprep.subr.bf16.mxu1 %v3230_v0  ;;  %v3929_v0 = vsub.s32 2, %v3918_v48 }
 0x13b   :  { %578 = vmatpush1.bf16.msra.mxu1 %v3228_v1  ;;  %v3932_v1 = vsub.s32 3, %v3918_v48 }
 0x13c   :  { %579 = vmatprep.subr.bf16.mxu1 %v3233_v22 }
 0x13f   :  { %580 = vmatpush1.bf16.msra.mxu1 %v3231_v2 }
 0x140   :  { %581 = vmatprep.subr.bf16.mxu1 %v3236_v3 }
 0x143   :  { %582 = vmatpush1.bf16.msra.mxu1 %v3234_v4  ;;  %v363_v4 = vrot.slane %v87_v50, %v3929_v0 }
 0x144   :  { %583 = vmatprep.subr.bf16.mxu1 %v3239_v5  ;;  %v367_v5 = vrot.slane %v87_v50, %v3932_v1  ;;  %v3302_v50 = vld [vmem:[#allocation5 + $0x10] ss:$48 sps:$4 sm:$0xff]  }
 0x147   :  { %584 = vmatpush1.bf16.msra.mxu1 %v3237_v6 }
 0x148   :  { %585 = vmatprep.subr.bf16.mxu1 %v3242_v7 }
 0x14b   :  { %586 = vmatpush1.bf16.msra.mxu1 %v3240_v8 }
 0x14c   :  { %587 = vmatprep.subr.bf16.mxu1 %v3245_v9  ;;  %v3278_v9 = vld [vmem:[#allocation5 + $0x28] ss:$48 sps:$4 sm:$0xff]  }
 0x14f   :  { %588 = vmatpush1.bf16.msra.mxu1 %v3243_v10 }
 0x150   :  { %3123 = vmatprep.subr.bf16.mxu1 %v3262_v30 }
 0x152   :  { %606 = vmatmul.mubr.bf16.vlgmr.msra.gmra.mrb[4].mxu1 %v350_v61 }
 0x153   :  { %3124 = vmatpush3.bf16.msra.mxu1 %v3263_v31  ;;  %v3290_v31 = vld [vmem:[#allocation5 + $0x1a8] ss:$48 sps:$4 sm:$0xff]  }
 0x154   :  { %3125 = vmatprep.subr.bf16.mxu1 %v3264_v32 }
 0x157   :  { %3126 = vmatpush3.bf16.msra.mxu1 %v3265_v33  ;;  %v3295_v33 = vld [vmem:[#allocation5 + $0x20c] ss:$48 sps:$4 sm:$0xff]  }
 0x158   :  { %3127 = vmatprep.subr.bf16.mxu1 %v3266_v34  ;;  %v3293_v34 = vld [vmem:[#allocation5 + $0x208] ss:$48 sps:$4 sm:$0xff]  }
 0x15b   :  { %3128 = vmatpush3.bf16.msra.mxu1 %v3267_v35  ;;  %v3298_v35 = vld [vmem:[#allocation5 + $0x26c] ss:$48 sps:$4 sm:$0xff]  }
 0x15c   :  { %3129 = vmatprep.subr.bf16.mxu1 %v3268_v36  ;;  %v3296_v36 = vld [vmem:[#allocation5 + $0x268] ss:$48 sps:$4 sm:$0xff]  }
 0x15f   :  { %3130 = vmatpush3.bf16.msra.mxu1 %v3269_v37  ;;  %v3301_v37 = vld [vmem:[#allocation5 + $0x2cc] ss:$48 sps:$4 sm:$0xff]  }
 0x160   :  { %3131 = vmatprep.subr.bf16.mxu1 %v3270_v38 }
 0x163   :  { %3132 = vmatpush3.bf16.msra.mxu1 %v3271_v39  ;;  %v3299_v39 = vld [vmem:[#allocation5 + $0x2c8] ss:$48 sps:$4 sm:$0xff]  }
 0x164   :  { %3133 = vmatprep.subr.bf16.mxu1 %v3272_v40 }
 0x167   :  { %3134 = vmatpush3.bf16.msra.mxu1 %v3273_v41 }
 0x168   :  { %3135 = vmatprep.subr.bf16.mxu1 %v3274_v42 }
 0x16b   :  { %3136 = vmatpush3.bf16.msra.mxu1 %v3275_v44  ;;  %v3634_v44 = vld [vmem:[#allocation2] sm:$0x3] }
 0x16c   :  { %3137 = vmatprep.subr.bf16.mxu1 %v3276_v45  ;;  %v1004_v45 = vpack.c.bf16 %v3634_v44, %v3634_v44  ;;  %v3374_v44 = vld [vmem:[#allocation7] ss:$20 sps:$4 sm:$0xff]  }
 0x16f   :  { %3138 = vmatpush3.bf16.msra.mxu1 %v3277_v46 }
 0x205   :  { %v566_v53 = vpop.f32.mrb[0].mxu1 }
 0x206   :  { %v567_v54 = vadd.f32 %v566_v53, %v355_v27  ;;  %v568_v55 = vpop.f32.mrb[1].mxu1  ;;  %v3304_v27 = vld [vmem:[#allocation5 + $0x14] ss:$48 sps:$4 sm:$0xff]   ;;  %v3307_v53 = vld [vmem:[#allocation5 + $0x1c] ss:$48 sps:$4 sm:$0xff]  }
 0x207   :  { %v569_v56 = vadd.f32 %v568_v55, %v359_v52  ;;  %v570_v57 = vpop.f32.mrb[2].mxu1  ;;  %v3305_v52 = vld [vmem:[#allocation5 + $0x18] ss:$48 sps:$4 sm:$0xff]   ;;  %1471 = vmatprep.subr.bf16.mxu1 %v3304_v27  ;;  %v3313_v55 = vld [vmem:[#allocation5 + $0x7c] ss:$48 sps:$4 sm:$0xff]  }
 0x208   :  { %v2847_v58 = vmul.f32 -1.442695, %v567_v54  ;;  %v571_v59 = vpop.f32.mrb[3].mxu1  ;;  %v3311_v57 = vld [vmem:[#allocation5 + $0x78] ss:$48 sps:$4 sm:$0xff]  }
 0x209   :  { %v2848_v43 = vmul.f32 -1.442695, %v569_v56  ;;  %v3319_v59 = vld [vmem:[#allocation5 + $0xdc] ss:$48 sps:$4 sm:$0xff]   ;;  %v3388_v27 = vld [vmem:[#allocation7 + $0x54] ss:$20 sps:$4 sm:$0xff]  }
 0x20a   :  { %3586 = vpow2.f32 %v2847_v58  ;;  %v3316_v58 = vld [vmem:[#allocation5 + $0xd4] ss:$48 sps:$4 sm:$0xff]  }
 0x20b   :  { %3588 = vpow2.f32 %v2848_v43  ;;  %v3314_v43 = vld [vmem:[#allocation5 + $0xd0] ss:$48 sps:$4 sm:$0xff]  }
 0x214   :  { %v3587_v60 = vpop.eup %3586 }
 0x215   :  { %v3589_v61 = vpop.eup %3588  ;;  %v626_v62 = vadd.f32 1.0, %v3587_v60  ;;  %v3317_v60 = vld [vmem:[#allocation5 + $0xd8] ss:$48 sps:$4 sm:$0xff]  }
 0x216   :  { %v627_v63 = vadd.f32 1.0, %v3589_v61  ;;  %v3322_v61 = vld [vmem:[#allocation5 + $0x134] ss:$48 sps:$4 sm:$0xff]  }
 0x217   :  { %3590 = vrcp.f32 %v626_v62  ;;  %v3325_v62 = vld [vmem:[#allocation5 + $0x13c] ss:$48 sps:$4 sm:$0xff]  }
 0x218   :  { %3592 = vrcp.f32 %v627_v63  ;;  %v3320_v63 = vld [vmem:[#allocation5 + $0x130] ss:$48 sps:$4 sm:$0xff]  }
 0x221   :  { %v3591_v22 = vpop.eup %3590 }
 0x222   :  { %v3593_v2 = vpop.eup %3592  ;;  %v638_v3 = vmul.f32 %v3591_v22, %v567_v54  ;;  %v3310_v54 = vld [vmem:[#allocation5 + $0x74] ss:$48 sps:$4 sm:$0xff]   ;;  %v3323_v22 = vld [vmem:[#allocation5 + $0x138] ss:$48 sps:$4 sm:$0xff]  }
 0x223   :  { %v639_v6 = vmul.f32 %v3593_v2, %v569_v56  ;;  %v3308_v56 = vld [vmem:[#allocation5 + $0x70] ss:$48 sps:$4 sm:$0xff]   ;;  %v3328_v2 = vld [vmem:[#allocation5 + $0x194] ss:$48 sps:$4 sm:$0xff]  }
 0x224   :  { %v706_v10 = vpack.c.bf16 %v638_v3, %v638_v3  ;;  %v3331_v3 = vld [vmem:[#allocation5 + $0x19c] ss:$48 sps:$4 sm:$0xff]  }
 0x225   :  { %v607_v7 = vpop.f32.mrb[4].mxu1  ;;  %v707_v8 = vpack.c.bf16 %v639_v6, %v639_v6  ;;  %v3334_v6 = vld [vmem:[#allocation5 + $0x1f4] ss:$48 sps:$4 sm:$0xff]  }
 0x226   :  { %v608_v11 = vadd.f32 %v607_v7, %v363_v4  ;;  %v609_v12 = vpop.f32.mrb[5].mxu1  ;;  %v3326_v4 = vld [vmem:[#allocation5 + $0x190] ss:$48 sps:$4 sm:$0xff]   ;;  %v3337_v7 = vld [vmem:[#allocation5 + $0x1fc] ss:$48 sps:$4 sm:$0xff]  }
 0x227   :  { %v610_v14 = vadd.f32 %v609_v12, %v367_v5  ;;  %v611_v16 = vpop.f32.mrb[6].mxu1  ;;  %940 = vmatprep.mubr.bf16.mxu0 %v707_v8  ;;  %v3329_v5 = vld [vmem:[#allocation5 + $0x198] ss:$48 sps:$4 sm:$0xff]   ;;  %v3332_v8 = vld [vmem:[#allocation5 + $0x1f0] ss:$48 sps:$4 sm:$0xff]  }
 0x228   :  { %v2849_v17 = vmul.f32 -1.442695, %v608_v11  ;;  %v612_v18 = vpop.f32.mrb[7].mxu1  ;;  %941 = vmatmul.mubr.bf16.vlgmr.msra.gmra.mrb[0].mxu0 %v706_v10  ;;  %v3340_v10 = vld [vmem:[#allocation5 + $0x254] ss:$48 sps:$4 sm:$0xff]  }
 0x229   :  { %v2850_v19 = vmul.f32 -1.442695, %v610_v14  ;;  %1097 = vmatpush1.bf16.msra.mxu0 %v3278_v9  ;;  %1128 = vmatprep.mubr.bf16.mxu0 %v3787_v15  ;;  %v3335_v9 = vld [vmem:[#allocation5 + $0x1f8] ss:$48 sps:$4 sm:$0xff]   ;;  %v3343_v12 = vld [vmem:[#allocation5 + $0x25c] ss:$48 sps:$4 sm:$0xff]  }
 0x22a   :  { %3594 = vpow2.f32 %v2849_v17  ;;  %1098 = vmatprep.subr.bf16.mxu0 %v3283_v13  ;;  %v3341_v13 = vld [vmem:[#allocation5 + $0x258] ss:$48 sps:$4 sm:$0xff]   ;;  %v3344_v16 = vld [vmem:[#allocation5 + $0x2b0] ss:$48 sps:$4 sm:$0xff]   ;;  %v3349_v17 = vld [vmem:[#allocation5 + $0x2bc] ss:$48 sps:$4 sm:$0xff]  }
 0x22b   :  { %3596 = vpow2.f32 %v2850_v19  ;;  %v3347_v18 = vld [vmem:[#allocation5 + $0x2b8] ss:$48 sps:$4 sm:$0xff]   ;;  %v3352_v19 = vld [vmem:[#allocation5 + $0x24] ss:$48 sps:$4 sm:$0xff]  }
 0x22d   :  { %1099 = vmatpush1.bf16.msra.mxu0 %v3281_v20  ;;  %v3376_v20 = vld [vmem:[#allocation7 + $0x4] ss:$20 sps:$4 sm:$0xff]  }
 0x22e   :  { %1100 = vmatprep.subr.bf16.mxu0 %v3286_v21 }
 0x231   :  { %1101 = vmatpush1.bf16.msra.mxu0 %v3284_v23 }
 0x232   :  { %1102 = vmatprep.subr.bf16.mxu0 %v3289_v24 }
 0x234   :  { %v3595_v28 = vpop.eup %3594 }
 0x235   :  { %v3597_v29 = vpop.eup %3596  ;;  %v628_v30 = vadd.f32 1.0, %v3595_v28  ;;  %1103 = vmatpush1.bf16.msra.mxu0 %v3287_v25  ;;  %v2851_v28 = vld [vmem:[#allocation10 + $0x5] ss:$0 sm:$0xff] }
 0x236   :  { %v629_v32 = vadd.f32 1.0, %v3597_v29  ;;  %1104 = vmatprep.subr.bf16.mxu0 %v3292_v26 }
 0x237   :  { %3598 = vrcp.f32 %v628_v30 }
 0x238   :  { %3600 = vrcp.f32 %v629_v32 }
 0x239   :  { %1105 = vmatpush1.bf16.msra.mxu0 %v3290_v31 }
 0x23a   :  { %1106 = vmatprep.subr.bf16.mxu0 %v3295_v33 }
 0x23d   :  { %1107 = vmatpush1.bf16.msra.mxu0 %v3293_v34 }
 0x23e   :  { %1108 = vmatprep.subr.bf16.mxu0 %v3298_v35 }
 0x241   :  { %v3599_v38 = vpop.eup %3598  ;;  %1109 = vmatpush1.bf16.msra.mxu0 %v3296_v36 }
 0x242   :  { %v3601_v40 = vpop.eup %3600  ;;  %v640_v41 = vmul.f32 %v3599_v38, %v608_v11  ;;  %1110 = vmatprep.subr.bf16.mxu0 %v3301_v37  ;;  %v3338_v11 = vld [vmem:[#allocation5 + $0x250] ss:$48 sps:$4 sm:$0xff]  }
 0x243   :  { %v641_v42 = vmul.f32 %v3601_v40, %v610_v14  ;;  %v3346_v14 = vld [vmem:[#allocation5 + $0x2b4] ss:$48 sps:$4 sm:$0xff]   ;;  %v3350_v40 = vld [vmem:[#allocation5 + $0x20] ss:$48 sps:$4 sm:$0xff]  }
 0x244   :  { %v708_v47 = vpack.c.bf16 %v640_v41, %v640_v41 }
 0x245   :  { %v709_v46 = vpack.c.bf16 %v641_v42, %v641_v42  ;;  %1111 = vmatpush1.bf16.msra.mxu0 %v3299_v39  ;;  %v3355_v42 = vld [vmem:[#allocation5 + $0x84] ss:$48 sps:$4 sm:$0xff]  }
 0x246   :  { %1512 = vmatprep.subr.bf16.mxu0 %v3307_v53  ;;  %v3361_v53 = vld [vmem:[#allocation5 + $0x144] ss:$48 sps:$4 sm:$0xff]  }
 0x247   :  { %980 = vmatprep.mubr.bf16.mxu1 %v709_v46  ;;  %v3353_v46 = vld [vmem:[#allocation5 + $0x80] ss:$48 sps:$4 sm:$0xff]  }
 0x248   :  { %981 = vmatmul.mubr.bf16.vlgmr.msra.gmra.mrb[8].mxu1 %v708_v47  ;;  %1129 = vmatmul.mubr.bf16.vlgmr.msra.gmra.mrb[4].mxu0 %v1004_v45  ;;  %v3382_v45 = vld [vmem:[#allocation7 + $0x2c] ss:$20 sps:$4 sm:$0xff]   ;;  %v3358_v47 = vld [vmem:[#allocation5 + $0xe4] ss:$48 sps:$4 sm:$0xff]  }
 0x249   :  { %1503 = vmatprep.mubr.bf16.mxu1 %v3787_v15  ;;  %1544 = vmatprep.mubr.bf16.mxu0 %v3787_v15 }
 0x24a   :  { %1472 = vmatpush1.bf16.msra.mxu1 %v3302_v50  ;;  %1513 = vmatpush1.bf16.msra.mxu0 %v3305_v52  ;;  %v3380_v50 = vld [vmem:[#allocation7 + $0x28] ss:$20 sps:$4 sm:$0xff]   ;;  %v3356_v52 = vld [vmem:[#allocation5 + $0xe0] ss:$48 sps:$4 sm:$0xff]  }
 0x24b   :  { %1473 = vmatprep.subr.bf16.mxu1 %v3310_v54  ;;  %1514 = vmatprep.subr.bf16.mxu0 %v3313_v55  ;;  %v3386_v54 = vld [vmem:[#allocation7 + $0x50] ss:$20 sps:$4 sm:$0xff]  }
 0x24c   :  { %v3394_v55 = vld [vmem:[#allocation7 + $0x7c] ss:$20 sps:$4 sm:$0xff]  }
 0x24e   :  { %1474 = vmatpush1.bf16.msra.mxu1 %v3308_v56  ;;  %1515 = vmatpush1.bf16.msra.mxu0 %v3311_v57  ;;  %v3359_v56 = vld [vmem:[#allocation5 + $0x140] ss:$48 sps:$4 sm:$0xff]   ;;  %v3364_v57 = vld [vmem:[#allocation5 + $0x1a4] ss:$48 sps:$4 sm:$0xff]  }
 0x24f   :  { %1475 = vmatprep.subr.bf16.mxu1 %v3316_v58  ;;  %1516 = vmatprep.subr.bf16.mxu0 %v3319_v59  ;;  %v3400_v58 = vld [vmem:[#allocation7 + $0xa4] ss:$20 sps:$4 sm:$0xff]   ;;  %v3362_v59 = vld [vmem:[#allocation5 + $0x1a0] ss:$48 sps:$4 sm:$0xff]  }
 0x252   :  { %1476 = vmatpush1.bf16.msra.mxu1 %v3314_v43  ;;  %1517 = vmatpush1.bf16.msra.mxu0 %v3317_v60  ;;  %v3367_v43 = vld [vmem:[#allocation5 + $0x204] ss:$48 sps:$4 sm:$0xff]  }
 0x253   :  { %1477 = vmatprep.subr.bf16.mxu1 %v3322_v61  ;;  %1518 = vmatprep.subr.bf16.mxu0 %v3325_v62  ;;  %v3398_v60 = vld [vmem:[#allocation7 + $0xa0] ss:$20 sps:$4 sm:$0xff]  }
 0x254   :  { %v3406_v61 = vld [vmem:[#allocation7 + $0xcc] ss:$20 sps:$4 sm:$0xff]  }
 0x255   :  { %v3365_v62 = vld [vmem:[#allocation5 + $0x200] ss:$48 sps:$4 sm:$0xff]  }
 0x256   :  { %1478 = vmatpush1.bf16.msra.mxu1 %v3320_v63  ;;  %1519 = vmatpush1.bf16.msra.mxu0 %v3323_v22  ;;  %v3370_v63 = vld [vmem:[#allocation5 + $0x264] ss:$48 sps:$4 sm:$0xff]   ;;  %v3404_v22 = vld [vmem:[#allocation7 + $0xc8] ss:$20 sps:$4 sm:$0xff]  }
 0x257   :  { %1479 = vmatprep.subr.bf16.mxu1 %v3328_v2  ;;  %1520 = vmatprep.subr.bf16.mxu0 %v3331_v3  ;;  %v3412_v2 = vld [vmem:[#allocation7 + $0xf4] ss:$20 sps:$4 sm:$0xff]   ;;  %v3368_v3 = vld [vmem:[#allocation5 + $0x260] ss:$48 sps:$4 sm:$0xff]  }
 0x25a   :  { %1480 = vmatpush1.bf16.msra.mxu1 %v3326_v4  ;;  %1521 = vmatpush1.bf16.msra.mxu0 %v3329_v5  ;;  %v3373_v4 = vld [vmem:[#allocation5 + $0x2c4] ss:$48 sps:$4 sm:$0xff]  }
 0x25b   :  { %1481 = vmatprep.subr.bf16.mxu1 %v3334_v6  ;;  %1522 = vmatprep.subr.bf16.mxu0 %v3337_v7  ;;  %v3410_v5 = vld [vmem:[#allocation7 + $0xf0] ss:$20 sps:$4 sm:$0xff]  }
 0x25c   :  { %v3418_v6 = vld [vmem:[#allocation7 + $0x11c] ss:$20 sps:$4 sm:$0xff]  }
 0x25d   :  { %v3371_v7 = vld [vmem:[#allocation5 + $0x2c0] ss:$48 sps:$4 sm:$0xff]  }
 0x25e   :  { %1482 = vmatpush1.bf16.msra.mxu1 %v3332_v8  ;;  %1523 = vmatpush1.bf16.msra.mxu0 %v3335_v9  ;;  %v3379_v8 = vld [vmem:[#allocation7 + $0xc] ss:$20 sps:$4 sm:$0xff]  }
 0x25f   :  { %1483 = vmatprep.subr.bf16.mxu1 %v3340_v10  ;;  %1524 = vmatprep.subr.bf16.mxu0 %v3343_v12  ;;  %v3416_v9 = vld [vmem:[#allocation7 + $0x118] ss:$20 sps:$4 sm:$0xff]   ;;  %v3385_v12 = vld [vmem:[#allocation7 + $0x34] ss:$20 sps:$4 sm:$0xff]  }
 0x260   :  { %v3424_v10 = vld [vmem:[#allocation7 + $0x144] ss:$20 sps:$4 sm:$0xff]  }
 0x262   :  { %1484 = vmatpush1.bf16.msra.mxu1 %v3338_v11  ;;  %1525 = vmatpush1.bf16.msra.mxu0 %v3341_v13  ;;  %v3377_v11 = vld [vmem:[#allocation7 + $0x8] ss:$20 sps:$4 sm:$0xff]   ;;  %v3422_v13 = vld [vmem:[#allocation7 + $0x140] ss:$20 sps:$4 sm:$0xff]  }
 0x263   :  { %1485 = vmatprep.subr.bf16.mxu1 %v3346_v14  ;;  %1526 = vmatprep.subr.bf16.mxu0 %v3349_v17  ;;  %v3430_v14 = vld [vmem:[#allocation7 + $0x16c] ss:$20 sps:$4 sm:$0xff]   ;;  %v3391_v17 = vld [vmem:[#allocation7 + $0x5c] ss:$20 sps:$4 sm:$0xff]  }
 0x266   :  { %1486 = vmatpush1.bf16.msra.mxu1 %v3344_v16  ;;  %1527 = vmatpush1.bf16.msra.mxu0 %v3347_v18  ;;  %v3383_v16 = vld [vmem:[#allocation7 + $0x30] ss:$20 sps:$4 sm:$0xff]   ;;  %v3428_v18 = vld [vmem:[#allocation7 + $0x168] ss:$20 sps:$4 sm:$0xff]  }
 0x267   :  { %1553 = vmatprep.subr.bf16.mxu1 %v3352_v19  ;;  %2003 = vmatprep.subr.bf16.mxu0 %v3376_v20  ;;  %v3436_v19 = vld [vmem:[#allocation7 + $0x194] ss:$20 sps:$4 sm:$0xff]   ;;  %v3389_v20 = vld [vmem:[#allocation7 + $0x58] ss:$20 sps:$4 sm:$0xff]  }
 0x2fb   :  { %v3117_v21 = vpop.f32.mrb[0].mxu0 }
 0x2fc   :  { %v3118_v23 = vpop.f32.mrb[1].mxu0 }
 0x2fd   :  { %v3119_v24 = vadd.f32 %v3118_v23, %v3117_v21  ;;  %v3120_v25 = vpop.f32.mrb[2].mxu0  ;;  %v3397_v21 = vld [vmem:[#allocation7 + $0x84] ss:$20 sps:$4 sm:$0xff]  }
 0x2fe   :  { %v3121_v26 = vpop.f32.mrb[3].mxu0  ;;  %v3434_v23 = vld [vmem:[#allocation7 + $0x190] ss:$20 sps:$4 sm:$0xff]   ;;  %v3395_v25 = vld [vmem:[#allocation7 + $0x80] ss:$20 sps:$4 sm:$0xff]  }
 0x2ff   :  { %v943_v33 = vadd.f32 %v3119_v24, %v2851_v28  ;;  %v3442_v24 = vld [vmem:[#allocation7 + $0x1bc] ss:$20 sps:$4 sm:$0xff]   ;;  %v3403_v26 = vld [vmem:[#allocation7 + $0xac] ss:$20 sps:$4 sm:$0xff]  }
 0x300   :  { %v3440_v28 = vld [vmem:[#allocation7 + $0x1b8] ss:$20 sps:$4 sm:$0xff]  }
 0x31b   :  { %v3139_v29 = vpop.f32.mrb[8].mxu1  ;;  %v3939_v30 = vpop.f32.mrb[4].mxu0 }
 0x31c   :  { %v3140_v31 = vpop.f32.mrb[9].mxu1  ;;  %v3941_v32 = vpop.f32.mrb[5].mxu0 }
 0x31d   :  { %v3141_v34 = vadd.f32 %v3140_v31, %v3139_v29  ;;  %v3142_v35 = vpop.f32.mrb[10].mxu1  ;;  %v1134_v36 = vpop.f32.mrb[6].mxu0  ;;  %v3448_v29 = vld [vmem:[#allocation7 + $0x1e4] ss:$20 sps:$4 sm:$0xff]   ;;  %v3401_v31 = vld [vmem:[#allocation7 + $0xa8] ss:$20 sps:$4 sm:$0xff]  }
 0x31e   :  { %v3143_v37 = vpop.f32.mrb[11].mxu1  ;;  %v1135_v38 = vpop.f32.mrb[7].mxu0  ;;  %v3454_v35 = vld [vmem:[#allocation7 + $0x20c] ss:$20 sps:$4 sm:$0xff]   ;;  %v3407_v36 = vld [vmem:[#allocation7 + $0xd0] ss:$20 sps:$4 sm:$0xff]  }
 0x31f   :  { %v983_v39 = vadd.f32 %v3141_v34, %v943_v33  ;;  %v3409_v33 = vld [vmem:[#allocation7 + $0xd4] ss:$20 sps:$4 sm:$0xff]   ;;  %v3415_v37 = vld [vmem:[#allocation7 + $0xfc] ss:$20 sps:$4 sm:$0xff]  }
 0x320   :  { %v3446_v34 = vld [vmem:[#allocation7 + $0x1e0] ss:$20 sps:$4 sm:$0xff]   ;;  %v3452_v38 = vld [vmem:[#allocation7 + $0x208] ss:$20 sps:$4 sm:$0xff]  }
 0x321   :  { %v3943_v41 = vpack.c.bf16 %v983_v39, %v983_v39  ;;  %v3413_v39 = vld [vmem:[#allocation7 + $0xf8] ss:$20 sps:$4 sm:$0xff]  }
 0x323   :  { %1504 = vmatmul.mubr.bf16.vlgmr.msra.gmra.mrb[12].mxu1 %v3943_v41  ;;  %1545 = vmatmul.mubr.bf16.vlgmr.msra.gmra.mrb[8].mxu0 %v3943_v41 }
 0x324   :  { %1554 = vmatpush1.bf16.msra.mxu1 %v3350_v40  ;;  %1585 = vmatprep.mubr.bf16.mxu1 %v3787_v15  ;;  %v3392_v15 = vld [vmem:[#allocation7 + $0x78] ss:$20 sps:$4 sm:$0xff]  }
 0x325   :  { %1555 = vmatprep.subr.bf16.mxu1 %v3355_v42  ;;  %2004 = vmatpush1.bf16.msra.mxu0 %v3374_v44  ;;  %v3421_v40 = vld [vmem:[#allocation7 + $0x124] ss:$20 sps:$4 sm:$0xff]   ;;  %v3427_v42 = vld [vmem:[#allocation7 + $0x14c] ss:$20 sps:$4 sm:$0xff]   ;;  %v3425_v44 = vld [vmem:[#allocation7 + $0x148] ss:$20 sps:$4 sm:$0xff]  }
 0x326   :  { %2005 = vmatprep.subr.bf16.mxu0 %v3382_v45  ;;  %v3433_v45 = vld [vmem:[#allocation7 + $0x174] ss:$20 sps:$4 sm:$0xff]  }
 0x328   :  { %1556 = vmatpush1.bf16.msra.mxu1 %v3353_v46  ;;  %v3431_v46 = vld [vmem:[#allocation7 + $0x170] ss:$20 sps:$4 sm:$0xff]  }
 0x329   :  { %1557 = vmatprep.subr.bf16.mxu1 %v3358_v47  ;;  %2006 = vmatpush1.bf16.msra.mxu0 %v3380_v50  ;;  %v3439_v47 = vld [vmem:[#allocation7 + $0x19c] ss:$20 sps:$4 sm:$0xff]   ;;  %v3437_v50 = vld [vmem:[#allocation7 + $0x198] ss:$20 sps:$4 sm:$0xff]  }
 0x32a   :  { %2007 = vmatprep.subr.bf16.mxu0 %v3388_v27  ;;  %v3445_v27 = vld [vmem:[#allocation7 + $0x1c4] ss:$20 sps:$4 sm:$0xff]  }
 0x32c   :  { %1558 = vmatpush1.bf16.msra.mxu1 %v3356_v52  ;;  %v3443_v52 = vld [vmem:[#allocation7 + $0x1c0] ss:$20 sps:$4 sm:$0xff]  }
 0x32d   :  { %1559 = vmatprep.subr.bf16.mxu1 %v3361_v53  ;;  %2008 = vmatpush1.bf16.msra.mxu0 %v3386_v54  ;;  %v3451_v53 = vld [vmem:[#allocation7 + $0x1ec] ss:$20 sps:$4 sm:$0xff]   ;;  %v3449_v54 = vld [vmem:[#allocation7 + $0x1e8] ss:$20 sps:$4 sm:$0xff]  }
 0x32e   :  { %2009 = vmatprep.subr.bf16.mxu0 %v3394_v55  ;;  %v3457_v55 = vld [vmem:[#allocation7 + $0x214] ss:$20 sps:$4 sm:$0xff]  }
 0x330   :  { %1560 = vmatpush1.bf16.msra.mxu1 %v3359_v56  ;;  %v3455_v56 = vld [vmem:[#allocation7 + $0x210] ss:$20 sps:$4 sm:$0xff]  }
 0x331   :  { %1561 = vmatprep.subr.bf16.mxu1 %v3364_v57  ;;  %2010 = vmatpush1.bf16.msra.mxu0 %v3392_v15  ;;  %v3460_v57 = vld [vmem:[#allocation7 + $0x234] ss:$20 sps:$4 sm:$0xff]   ;;  %v3463_v15 = vld [vmem:[#allocation7 + $0x23c] ss:$20 sps:$4 sm:$0xff]  }
 0x332   :  { %2011 = vmatprep.subr.bf16.mxu0 %v3400_v58  ;;  %v3458_v58 = vld [vmem:[#allocation7 + $0x230] ss:$20 sps:$4 sm:$0xff]  }
 0x334   :  { %1562 = vmatpush1.bf16.msra.mxu1 %v3362_v59  ;;  %v3461_v59 = vld [vmem:[#allocation7 + $0x238] ss:$20 sps:$4 sm:$0xff]  }
 0x335   :  { %1563 = vmatprep.subr.bf16.mxu1 %v3367_v43  ;;  %2012 = vmatpush1.bf16.msra.mxu0 %v3398_v60  ;;  %v3466_v43 = vld [vmem:[#allocation7 + $0x25c] ss:$20 sps:$4 sm:$0xff]   ;;  %v3469_v60 = vld [vmem:[#allocation7 + $0x264] ss:$20 sps:$4 sm:$0xff]  }
 0x336   :  { %2013 = vmatprep.subr.bf16.mxu0 %v3406_v61  ;;  %v3464_v61 = vld [vmem:[#allocation7 + $0x258] ss:$20 sps:$4 sm:$0xff]  }
 0x338   :  { %1564 = vmatpush1.bf16.msra.mxu1 %v3365_v62  ;;  %v3467_v62 = vld [vmem:[#allocation7 + $0x260] ss:$20 sps:$4 sm:$0xff]  }
 0x339   :  { %1565 = vmatprep.subr.bf16.mxu1 %v3370_v63  ;;  %2014 = vmatpush1.bf16.msra.mxu0 %v3404_v22  ;;  %v3472_v63 = vld [vmem:[#allocation8 + $0x8] ss:$12 sps:$4 sm:$0xff]   ;;  %v89_v22 = vld [vmem:[#allocation10 + $0x6] sm:$0x3] }
 0x33a   :  { %2015 = vmatprep.subr.bf16.mxu0 %v3412_v2  ;;  %v1009_v2 = vrot.slane %v89_v22, %v3921_v49 }
 0x33c   :  { %1566 = vmatpush1.bf16.msra.mxu1 %v3368_v3  ;;  %v1013_v3 = vrot.slane %v89_v22, %v3924_v51  ;;  %v3508_v22 = vld [vmem:[#allocation8 + $0x128] ss:$12 sps:$4 sm:$0xff]  }
 0x33d   :  { %1567 = vmatprep.subr.bf16.mxu1 %v3373_v4  ;;  %2016 = vmatpush1.bf16.msra.mxu0 %v3410_v5  ;;  %v1131_v4 = vadd.f32 %v3939_v30, %v1009_v2  ;;  %v3506_v2 = vld [vmem:[#allocation8 + $0x124] ss:$12 sps:$4 sm:$0xff]  }
 0x33e   :  { %2017 = vmatprep.subr.bf16.mxu0 %v3418_v6  ;;  %v1133_v5 = vadd.f32 %v3941_v32, %v1013_v3  ;;  %v3511_v3 = vld [vmem:[#allocation8 + $0x140] ss:$12 sps:$4 sm:$0xff]  }
 0x33f   :  { %v2900_v6 = vmul.f32 -1.442695, %v1131_v4 }
 0x340   :  { %1568 = vmatpush1.bf16.msra.mxu1 %v3371_v7  ;;  %v2901_v7 = vmul.f32 -1.442695, %v1133_v5 }
 0x341   :  { %2044 = vmatprep.subr.bf16.mxu1 %v3379_v8  ;;  %2018 = vmatpush1.bf16.msra.mxu0 %v3416_v9  ;;  %3602 = vpow2.f32 %v2900_v6  ;;  %v3512_v6 = vld [vmem:[#allocation8 + $0x154] ss:$12 sps:$4 sm:$0xff]  }
 0x342   :  { %2019 = vmatprep.subr.bf16.mxu0 %v3424_v10  ;;  %3604 = vpow2.f32 %v2901_v7  ;;  %v3517_v7 = vld [vmem:[#allocation8 + $0x170] ss:$12 sps:$4 sm:$0xff]  }
 0x343   :  { %1586 = vmatmul.mubr.bf16.vlgmr.msra.gmra.mrb[16].mxu1 %v3943_v41  ;;  %v3419_v41 = vld [vmem:[#allocation7 + $0x120] ss:$20 sps:$4 sm:$0xff]  }
 0x344   :  { %2045 = vmatpush1.bf16.msra.mxu1 %v3377_v11 }
 0x345   :  { %2046 = vmatprep.subr.bf16.mxu1 %v3385_v12  ;;  %2020 = vmatpush1.bf16.msra.mxu0 %v3422_v13  ;;  %v3953_v12 = vld [vmem:[#allocation10 + $0x8] sm:$0x3f] }
 0x346   :  { %2021 = vmatprep.subr.bf16.mxu0 %v3430_v14  ;;  %v1204_v13 = vrot.slane %v3953_v12, %v3921_v49  ;;  %v1208_v30 = vrot.slane %v3953_v12, %v3924_v51 }
 0x348   :  { %2047 = vmatpush1.bf16.msra.mxu1 %v3383_v16 }
 0x349   :  { %2048 = vmatprep.subr.bf16.mxu1 %v3391_v17  ;;  %2022 = vmatpush1.bf16.msra.mxu0 %v3428_v18 }
 0x34a   :  { %2023 = vmatprep.subr.bf16.mxu0 %v3436_v19 }
 0x34b   :  { %v3603_v8 = vpop.eup %3602 }
 0x34c   :  { %2049 = vmatpush1.bf16.msra.mxu1 %v3389_v20  ;;  %v3605_v9 = vpop.eup %3604  ;;  %v1143_v10 = vadd.f32 1.0, %v3603_v8  ;;  %v3515_v8 = vld [vmem:[#allocation8 + $0x16c] ss:$12 sps:$4 sm:$0xff]  }
 0x34d   :  { %2050 = vmatprep.subr.bf16.mxu1 %v3397_v21  ;;  %2024 = vmatpush1.bf16.msra.mxu0 %v3434_v23  ;;  %v1144_v11 = vadd.f32 1.0, %v3605_v9  ;;  %v3520_v9 = vld [vmem:[#allocation8 + $0x188] ss:$12 sps:$4 sm:$0xff]  }
 0x34e   :  { %2025 = vmatprep.subr.bf16.mxu0 %v3442_v24  ;;  %3606 = vrcp.f32 %v1143_v10  ;;  %v91_v10 = vld [vmem:[#allocation10 + $0xe] sm:$0xf] }
 0x34f   :  { %3608 = vrcp.f32 %v1144_v11  ;;  %v1666_v11 = vrot.slane %v91_v10, %v3921_v49 }
 0x350   :  { %2051 = vmatpush1.bf16.msra.mxu1 %v3395_v25 }
 0x351   :  { %2052 = vmatprep.subr.bf16.mxu1 %v3403_v26  ;;  %2026 = vmatpush1.bf16.msra.mxu0 %v3440_v28 }
 0x352   :  { %2027 = vmatprep.subr.bf16.mxu0 %v3448_v29 }
 0x354   :  { %2053 = vmatpush1.bf16.msra.mxu1 %v3401_v31 }
 0x355   :  { %2054 = vmatprep.subr.bf16.mxu1 %v3409_v33  ;;  %2028 = vmatpush1.bf16.msra.mxu0 %v3446_v34 }
 0x356   :  { %2029 = vmatprep.subr.bf16.mxu0 %v3454_v35  ;;  %v3470_v35 = vld [vmem:[#allocation8 + $0x4] ss:$12 sps:$4 sm:$0xff]  }
 0x358   :  { %2055 = vmatpush1.bf16.msra.mxu1 %v3407_v36  ;;  %v3607_v14 = vpop.eup %3606 }
 0x359   :  { %2056 = vmatprep.subr.bf16.mxu1 %v3415_v37  ;;  %2030 = vmatpush1.bf16.msra.mxu0 %v3452_v38  ;;  %v3609_v32 = vpop.eup %3608  ;;  %v1149_v18 = vmul.f32 %v3607_v14, %v1131_v4  ;;  %v3475_v37 = vld [vmem:[#allocation8 + $0x20] ss:$12 sps:$4 sm:$0xff]   ;;  %v3473_v38 = vld [vmem:[#allocation8 + $0x1c] ss:$12 sps:$4 sm:$0xff]   ;;  %v1670_v14 = vrot.slane %v91_v10, %v3924_v51 }
 0x35a   :  { %2031 = vmatprep.subr.bf16.mxu0 %v3460_v57  ;;  %v1150_v23 = vmul.f32 %v3609_v32, %v1133_v5  ;;  %v3491_v57 = vld [vmem:[#allocation8 + $0xac] ss:$12 sps:$4 sm:$0xff]   ;;  %v3509_v4 = vld [vmem:[#allocation8 + $0x13c] ss:$12 sps:$4 sm:$0xff]  }
 0x35b   :  { %v3514_v5 = vld [vmem:[#allocation8 + $0x158] ss:$12 sps:$4 sm:$0xff]  }
 0x35c   :  { %2057 = vmatpush1.bf16.msra.mxu1 %v3413_v39  ;;  %v3478_v39 = vld [vmem:[#allocation8 + $0x38] ss:$12 sps:$4 sm:$0xff]  }
 0x35d   :  { %2058 = vmatprep.subr.bf16.mxu1 %v3421_v40  ;;  %2032 = vmatpush1.bf16.msra.mxu0 %v3458_v58  ;;  %v3476_v40 = vld [vmem:[#allocation8 + $0x34] ss:$12 sps:$4 sm:$0xff]   ;;  %v3494_v58 = vld [vmem:[#allocation8 + $0xc4] ss:$12 sps:$4 sm:$0xff]  }
 0x35e   :  { %2033 = vmatprep.subr.bf16.mxu0 %v3466_v43  ;;  %v3497_v43 = vld [vmem:[#allocation8 + $0xdc] ss:$12 sps:$4 sm:$0xff]  }
 0x360   :  { %2059 = vmatpush1.bf16.msra.mxu1 %v3419_v41  ;;  %v3481_v41 = vld [vmem:[#allocation8 + $0x50] ss:$12 sps:$4 sm:$0xff]  }
 0x361   :  { %2060 = vmatprep.subr.bf16.mxu1 %v3427_v42  ;;  %2034 = vmatpush1.bf16.msra.mxu0 %v3464_v61  ;;  %v3479_v42 = vld [vmem:[#allocation8 + $0x4c] ss:$12 sps:$4 sm:$0xff]   ;;  %v3500_v61 = vld [vmem:[#allocation8 + $0xf4] ss:$12 sps:$4 sm:$0xff]  }
 0x362   :  { %2516 = vmatprep.subr.bf16.mxu0 %v3472_v63  ;;  %v3503_v63 = vld [vmem:[#allocation8 + $0x10c] ss:$12 sps:$4 sm:$0xff]  }
 0x364   :  { %2061 = vmatpush1.bf16.msra.mxu1 %v3425_v44  ;;  %v3484_v44 = vld [vmem:[#allocation8 + $0x68] ss:$12 sps:$4 sm:$0xff]  }
 0x365   :  { %2062 = vmatprep.subr.bf16.mxu1 %v3433_v45  ;;  %v3482_v45 = vld [vmem:[#allocation8 + $0x64] ss:$12 sps:$4 sm:$0xff]  }
 0x368   :  { %2063 = vmatpush1.bf16.msra.mxu1 %v3431_v46  ;;  %v3487_v46 = vld [vmem:[#allocation8 + $0x80] ss:$12 sps:$4 sm:$0xff]  }
 0x369   :  { %2064 = vmatprep.subr.bf16.mxu1 %v3439_v47  ;;  %v3485_v47 = vld [vmem:[#allocation8 + $0x7c] ss:$12 sps:$4 sm:$0xff]  }
 0x36c   :  { %2065 = vmatpush1.bf16.msra.mxu1 %v3437_v50  ;;  %v3490_v50 = vld [vmem:[#allocation8 + $0x98] ss:$12 sps:$4 sm:$0xff]  }
 0x36d   :  { %2066 = vmatprep.subr.bf16.mxu1 %v3445_v27  ;;  %v3488_v27 = vld [vmem:[#allocation8 + $0x94] ss:$12 sps:$4 sm:$0xff]  }
 0x370   :  { %2067 = vmatpush1.bf16.msra.mxu1 %v3443_v52 }
 0x371   :  { %2068 = vmatprep.subr.bf16.mxu1 %v3451_v53 }
 0x374   :  { %2069 = vmatpush1.bf16.msra.mxu1 %v3449_v54 }
 0x375   :  { %2070 = vmatprep.subr.bf16.mxu1 %v3457_v55 }
 0x378   :  { %2071 = vmatpush1.bf16.msra.mxu1 %v3455_v56  ;;  %v3493_v56 = vld [vmem:[#allocation8 + $0xb0] ss:$12 sps:$4 sm:$0xff]  }
 0x379   :  { %2072 = vmatprep.subr.bf16.mxu1 %v3463_v15  ;;  %v3496_v15 = vld [vmem:[#allocation8 + $0xc8] ss:$12 sps:$4 sm:$0xff]  }
 0x37c   :  { %2073 = vmatpush1.bf16.msra.mxu1 %v3461_v59  ;;  %v3499_v59 = vld [vmem:[#allocation8 + $0xe0] ss:$12 sps:$4 sm:$0xff]  }
 0x37d   :  { %2074 = vmatprep.subr.bf16.mxu1 %v3469_v60  ;;  %v3502_v60 = vld [vmem:[#allocation8 + $0xf8] ss:$12 sps:$4 sm:$0xff]  }
 0x380   :  { %2075 = vmatpush1.bf16.msra.mxu1 %v3467_v62  ;;  %v3505_v62 = vld [vmem:[#allocation8 + $0x110] ss:$12 sps:$4 sm:$0xff]  }
 0x3f6   :  { %v1505_v16 = vpop.f32.mrb[12].mxu1  ;;  %v3959_v17 = vpop.f32.mrb[8].mxu0 }
 0x3f7   :  { %v1506_v19 = vadd.f32 %v1505_v16, %v1204_v13  ;;  %v1507_v20 = vpop.f32.mrb[13].mxu1  ;;  %v3961_v21 = vpop.f32.mrb[9].mxu0  ;;  %v1674_v13 = vrot.slane %v91_v10, %v3929_v0 }
 0x3f8   :  { %v1508_v24 = vadd.f32 %v1507_v20, %v1208_v30  ;;  %v1509_v25 = vpop.f32.mrb[14].mxu1  ;;  %v1550_v26 = vpop.f32.mrb[10].mxu0  ;;  %v1678_v30 = vrot.slane %v91_v10, %v3932_v1  ;;  %v3530_v10 = vld [vmem:[#allocation8 + $0x1e4] ss:$12 sps:$4 sm:$0xff]  }
 0x3f9   :  { %v1594_v28 = vadd.f32 %v1506_v19, %v1149_v18  ;;  %v1510_v29 = vpop.f32.mrb[15].mxu1  ;;  %v1551_v31 = vpop.f32.mrb[11].mxu0 }
 0x3fa   :  { %v1595_v33 = vadd.f32 %v1508_v24, %v1150_v23 }
 0x3fb   :  { %v1660_v36 = vpack.c.bf16 %v1594_v28, %v1594_v28 }
 0x3fc   :  { %v1661_v34 = vpack.c.bf16 %v1595_v33, %v1595_v33 }
 0x3fe   :  { %2035 = vmatprep.mubr.bf16.mxu0 %v1661_v34  ;;  %2076 = vmatprep.mubr.bf16.mxu1 %v1661_v34 }
 0x3ff   :  { %2036 = vmatmul.mubr.bf16.vlgmr.msra.gmra.mrb[12].mxu0 %v1660_v36  ;;  %2077 = vmatmul.mubr.bf16.vlgmr.msra.gmra.mrb[20].mxu1 %v1660_v36 }
 0x400   :  { %2517 = vmatpush1.bf16.msra.mxu0 %v3470_v35 }
 0x401   :  { %2518 = vmatprep.subr.bf16.mxu0 %v3475_v37 }
 0x404   :  { %2519 = vmatpush1.bf16.msra.mxu0 %v3473_v38 }
 0x405   :  { %2520 = vmatprep.subr.bf16.mxu0 %v3478_v39 }
 0x408   :  { %2521 = vmatpush1.bf16.msra.mxu0 %v3476_v40 }
 0x409   :  { %2522 = vmatprep.subr.bf16.mxu0 %v3481_v41 }
 0x40c   :  { %2523 = vmatpush1.bf16.msra.mxu0 %v3479_v42 }
 0x40d   :  { %2524 = vmatprep.subr.bf16.mxu0 %v3484_v44 }
 0x410   :  { %2525 = vmatpush1.bf16.msra.mxu0 %v3482_v45 }
 0x411   :  { %2526 = vmatprep.subr.bf16.mxu0 %v3487_v46  ;;  %v1219_v46 = vsub.s32 4, %v3918_v48 }
 0x414   :  { %2527 = vmatpush1.bf16.msra.mxu0 %v3485_v47  ;;  %v1223_v47 = vsub.s32 5, %v3918_v48 }
 0x415   :  { %2528 = vmatprep.subr.bf16.mxu0 %v3490_v50  ;;  %v1212_v50 = vrot.slane %v3953_v12, %v3929_v0 }
 0x416   :  { %v3963_v52 = vpop.f32.mrb[16].mxu1 }
 0x417   :  { %v3965_v53 = vpop.f32.mrb[17].mxu1 }
 0x418   :  { %v1591_v54 = vpop.f32.mrb[18].mxu1  ;;  %2529 = vmatpush1.bf16.msra.mxu0 %v3488_v27  ;;  %v1220_v27 = vrot.slane %v3953_v12, %v1219_v46  ;;  %v3571_v46 = vld [vmem:[#allocation7 + $0x60] ss:$20 sps:$4 sm:$0xff]  }
 0x419   :  { %v1592_v55 = vpop.f32.mrb[19].mxu1  ;;  %2530 = vmatprep.subr.bf16.mxu0 %v3493_v56  ;;  %v1216_v54 = vrot.slane %v3953_v12, %v3932_v1  ;;  %v1224_v56 = vrot.slane %v3953_v12, %v1223_v47  ;;  %v3572_v47 = vld [vmem:[#allocation7 + $0x1c8] ss:$20 sps:$4 sm:$0xff]  }
 0x41c   :  { %2531 = vmatpush1.bf16.msra.mxu0 %v3491_v57 }
 0x41d   :  { %2532 = vmatprep.subr.bf16.mxu0 %v3496_v15  ;;  %v1547_v15 = vadd.f32 %v3959_v17, %v1212_v50  ;;  %v3573_v50 = vld [vmem:[#allocation7 + $0x88] ss:$20 sps:$4 sm:$0xff]  }
 0x420   :  { %2533 = vmatpush1.bf16.msra.mxu0 %v3494_v58 }
 0x421   :  { %2534 = vmatprep.subr.bf16.mxu0 %v3499_v59 }
 0x424   :  { %2535 = vmatpush1.bf16.msra.mxu0 %v3497_v43  ;;  %v1588_v43 = vadd.f32 %v3963_v52, %v1220_v27  ;;  %v3521_v52 = vld [vmem:[#allocation8 + $0x19c] ss:$12 sps:$4 sm:$0xff]   ;;  %v3574_v27 = vld [vmem:[#allocation7 + $0x1f0] ss:$20 sps:$4 sm:$0xff]  }
 0x425   :  { %2536 = vmatprep.subr.bf16.mxu0 %v3502_v60 }
 0x428   :  { %2537 = vmatpush1.bf16.msra.mxu0 %v3500_v61  ;;  %v1549_v61 = vadd.f32 %v3961_v21, %v1216_v54  ;;  %v3526_v21 = vld [vmem:[#allocation8 + $0x1b8] ss:$12 sps:$4 sm:$0xff]  }
 0x429   :  { %2538 = vmatprep.subr.bf16.mxu0 %v3505_v62  ;;  %v3575_v54 = vld [vmem:[#allocation7 + $0xb0] ss:$20 sps:$4 sm:$0xff]  }
 0x42c   :  { %2539 = vmatpush1.bf16.msra.mxu0 %v3503_v63  ;;  %v1590_v63 = vadd.f32 %v3965_v53, %v1224_v56  ;;  %v3529_v53 = vld [vmem:[#allocation8 + $0x1d0] ss:$12 sps:$4 sm:$0xff]   ;;  %v3577_v56 = vld [vmem:[#allocation7 + $0xd8] ss:$20 sps:$4 sm:$0xff]  }
 0x42d   :  { %2540 = vmatprep.subr.bf16.mxu0 %v3508_v22 }
 0x430   :  { %2541 = vmatpush1.bf16.msra.mxu0 %v3506_v2 }
 0x431   :  { %2542 = vmatprep.subr.bf16.mxu0 %v3511_v3 }
 0x434   :  { %2543 = vmatpush1.bf16.msra.mxu0 %v3509_v4  ;;  %v3518_v4 = vld [vmem:[#allocation8 + $0x184] ss:$12 sps:$4 sm:$0xff]  }
 0x435   :  { %2544 = vmatprep.subr.bf16.mxu0 %v3514_v5  ;;  %v3523_v5 = vld [vmem:[#allocation8 + $0x1a0] ss:$12 sps:$4 sm:$0xff]  }
 0x438   :  { %2545 = vmatpush1.bf16.msra.mxu0 %v3512_v6 }
 0x439   :  { %2546 = vmatprep.subr.bf16.mxu0 %v3517_v7  ;;  %v3524_v7 = vld [vmem:[#allocation8 + $0x1b4] ss:$12 sps:$4 sm:$0xff]  }
 0x43c   :  { %2547 = vmatpush1.bf16.msra.mxu0 %v3515_v8  ;;  %v3527_v8 = vld [vmem:[#allocation8 + $0x1cc] ss:$12 sps:$4 sm:$0xff]  }
 0x43d   :  { %2557 = vmatprep.subr.bf16.mxu0 %v3520_v9  ;;  %v3532_v9 = vld [vmem:[#allocation8 + $0x1e8] ss:$12 sps:$4 sm:$0xff]  }
 0x4d2   :  { %v2037_v32 = vpop.f32.mrb[12].mxu0  ;;  %v2078_v16 = vpop.f32.mrb[20].mxu1 }
 0x4d3   :  { %v2038_v18 = vadd.f32 %v2037_v32, %v1666_v11  ;;  %v2079_v19 = vadd.f32 %v2078_v16, %v1674_v13  ;;  %v2039_v20 = vpop.f32.mrb[13].mxu0  ;;  %v2080_v23 = vpop.f32.mrb[21].mxu1  ;;  %v3535_v11 = vld [vmem:[#allocation8 + $0x200] ss:$12 sps:$4 sm:$0xff]   ;;  %v3533_v13 = vld [vmem:[#allocation8 + $0x1fc] ss:$12 sps:$4 sm:$0xff]  }
 0x4d4   :  { %v2040_v24 = vadd.f32 %v2039_v20, %v1670_v14  ;;  %v2081_v25 = vadd.f32 %v2080_v23, %v1678_v30  ;;  %v2041_v26 = vpop.f32.mrb[14].mxu0  ;;  %v2082_v28 = vpop.f32.mrb[22].mxu1  ;;  %v3538_v14 = vld [vmem:[#allocation8 + $0x218] ss:$12 sps:$4 sm:$0xff]   ;;  %v3536_v30 = vld [vmem:[#allocation8 + $0x214] ss:$12 sps:$4 sm:$0xff]  }
 0x4d5   :  { %v3014_v29 = vmul.f32 -1.442695, %v2038_v18  ;;  %v3016_v31 = vmul.f32 -1.442695, %v2079_v19  ;;  %v2042_v33 = vpop.f32.mrb[15].mxu0  ;;  %v2083_v34 = vpop.f32.mrb[23].mxu1 }
 0x4d6   :  { %v3015_v35 = vmul.f32 -1.442695, %v2040_v24  ;;  %v3017_v36 = vmul.f32 -1.442695, %v2081_v25  ;;  %v3541_v32 = vld [vmem:[#allocation8 + $0x230] ss:$12 sps:$4 sm:$0xff]  }
 0x4d7   :  { %3610 = vpow2.f32 %v3014_v29  ;;  %v3539_v16 = vld [vmem:[#allocation8 + $0x22c] ss:$12 sps:$4 sm:$0xff]   ;;  %v3545_v23 = vld [vmem:[#allocation8 + $0x25c] ss:$12 sps:$4 sm:$0xff]  }
 0x4d8   :  { %3612 = vpow2.f32 %v3016_v31  ;;  %v3547_v20 = vld [vmem:[#allocation8 + $0x260] ss:$12 sps:$4 sm:$0xff]   ;;  %v3553_v26 = vld [vmem:[#allocation8 + $0x290] ss:$12 sps:$4 sm:$0xff]   ;;  %v3556_v29 = vld [vmem:[#allocation8 + $0x2a8] ss:$12 sps:$4 sm:$0xff]  }
 0x4d9   :  { %3614 = vpow2.f32 %v3015_v35  ;;  %v3551_v28 = vld [vmem:[#allocation8 + $0x28c] ss:$12 sps:$4 sm:$0xff]   ;;  %v3554_v31 = vld [vmem:[#allocation8 + $0x2a4] ss:$12 sps:$4 sm:$0xff]   ;;  %v3557_v34 = vld [vmem:[#allocation8 + $0x2bc] ss:$12 sps:$4 sm:$0xff]  }
 0x4da   :  { %3616 = vpow2.f32 %v3017_v36  ;;  %v3559_v33 = vld [vmem:[#allocation8 + $0x2c0] ss:$12 sps:$4 sm:$0xff]   ;;  %v3562_v35 = vld [vmem:[#allocation8 + $0x2d8] ss:$12 sps:$4 sm:$0xff]  }
 0x4db   :  { %v3560_v36 = vld [vmem:[#allocation8 + $0x2d4] ss:$12 sps:$4 sm:$0xff]  }
 0x4e1   :  { %v3611_v37 = vpop.eup %3610 }
 0x4e2   :  { %v3613_v38 = vpop.eup %3612  ;;  %v2097_v39 = vadd.f32 1.0, %v3611_v37  ;;  %v3565_v37 = vld [vmem:[#allocation8 + $0x2f0] ss:$12 sps:$4 sm:$0xff]  }
 0x4e3   :  { %v3615_v40 = vpop.eup %3614  ;;  %v2099_v41 = vadd.f32 1.0, %v3613_v38  ;;  %v3563_v38 = vld [vmem:[#allocation8 + $0x2ec] ss:$12 sps:$4 sm:$0xff]  }
 0x4e4   :  { %v3617_v42 = vpop.eup %3616  ;;  %3618 = vrcp.f32 %v2097_v39  ;;  %v2098_v44 = vadd.f32 1.0, %v3615_v40  ;;  %v3566_v40 = vld [vmem:[#allocation7 + $0x150] ss:$20 sps:$4 sm:$0xff]  }
 0x4e5   :  { %3620 = vrcp.f32 %v2099_v41  ;;  %v2100_v45 = vadd.f32 1.0, %v3617_v42  ;;  %v3567_v41 = vld [vmem:[#allocation7 + $0x10] ss:$20 sps:$4 sm:$0xff]   ;;  %3145 = vmatprep.subr.bf16.mxu1 %v3566_v40  ;;  %v3568_v42 = vld [vmem:[#allocation7 + $0x178] ss:$20 sps:$4 sm:$0xff]  }
 0x4e6   :  { %3622 = vrcp.f32 %v2098_v44  ;;  %3146 = vmatpush3.bf16.msra.mxu1 %v3567_v41  ;;  %v3569_v44 = vld [vmem:[#allocation7 + $0x38] ss:$20 sps:$4 sm:$0xff]  }
 0x4e7   :  { %3624 = vrcp.f32 %v2100_v45  ;;  %3147 = vmatprep.subr.bf16.mxu1 %v3568_v42  ;;  %v3570_v45 = vld [vmem:[#allocation7 + $0x1a0] ss:$20 sps:$4 sm:$0xff]  }
 0x4ea   :  { %3148 = vmatpush3.bf16.msra.mxu1 %v3569_v44 }
 0x4eb   :  { %3149 = vmatprep.subr.bf16.mxu1 %v3570_v45 }
 0x4ee   :  { %v3619_v55 = vpop.eup %3618  ;;  %3150 = vmatpush3.bf16.msra.mxu1 %v3571_v46 }
 0x4ef   :  { %v3621_v57 = vpop.eup %3620  ;;  %v2109_v58 = vmul.f32 %v3619_v55, %v2038_v18  ;;  %v3544_v18 = vld [vmem:[#allocation8 + $0x248] ss:$12 sps:$4 sm:$0xff]   ;;  %3151 = vmatprep.subr.bf16.mxu1 %v3572_v47  ;;  %v3576_v55 = vld [vmem:[#allocation7 + $0x218] ss:$20 sps:$4 sm:$0xff]  }
 0x4f0   :  { %v3623_v59 = vpop.eup %3622  ;;  %v2111_v60 = vmul.f32 %v3621_v57, %v2079_v19  ;;  %v3542_v19 = vld [vmem:[#allocation8 + $0x244] ss:$12 sps:$4 sm:$0xff]   ;;  %v3578_v57 = vld [vmem:[#allocation7 + $0x240] ss:$20 sps:$4 sm:$0xff]  }
 0x4f1   :  { %v3625_v48 = vpop.eup %3624  ;;  %v2113_v0 = vadd.f32 %v2109_v58, %v1547_v15  ;;  %v2110_v62 = vmul.f32 %v3623_v59, %v2040_v24  ;;  %v3550_v24 = vld [vmem:[#allocation8 + $0x278] ss:$12 sps:$4 sm:$0xff]   ;;  %v3579_v15 = vld [vmem:[#allocation7 + $0x100] ss:$20 sps:$4 sm:$0xff]   ;;  %v3580_v58 = vld [vmem:[#allocation7 + $0x268] ss:$20 sps:$4 sm:$0xff]  }
 0x4f2   :  { %v3983_v22 = vadd.f32 %v2111_v60, %v1588_v43  ;;  %v2112_v1 = vmul.f32 %v3625_v48, %v2081_v25  ;;  %v3548_v25 = vld [vmem:[#allocation8 + $0x274] ss:$12 sps:$4 sm:$0xff]   ;;  %3152 = vmatpush3.bf16.msra.mxu1 %v3573_v50  ;;  %v3581_v59 = vld [vmem:[#allocation7 + $0x128] ss:$20 sps:$4 sm:$0xff]   ;;  %v92_v43 = vld [vmem:[#allocation10 + $0x12] sm:$0x3] }
 0x4f3   :  { %v2114_v2 = vadd.f32 %v2110_v62, %v1549_v61  ;;  %v2181_v17 = vpack.c.bf16 %v2113_v0, %v2113_v0  ;;  %3153 = vmatprep.subr.bf16.mxu1 %v3574_v27  ;;  %v2189_v60 = vrot.slane %v92_v43, %v3921_v49  ;;  %v2193_v48 = vrot.slane %v92_v43, %v3924_v51 }
 0x4f4   :  { %v2116_v12 = vadd.f32 %v2112_v1, %v1590_v63  ;;  %v2183_v39 = vpack.c.bf16 %v3983_v22, %v3983_v22 }
 0x4f5   :  { %v2182_v3 = vpack.c.bf16 %v2114_v2, %v2114_v2 }
 0x4f6   :  { %v2184_v6 = vpack.c.bf16 %v2116_v12, %v2116_v12  ;;  %3154 = vmatpush3.bf16.msra.mxu1 %v3575_v54 }
 0x4f7   :  { %2548 = vmatprep.mubr.bf16.mxu0 %v2182_v3  ;;  %3155 = vmatprep.subr.bf16.mxu1 %v3576_v55 }
 0x4f8   :  { %2549 = vmatmul.mubr.bf16.vlgmr.msra.gmra.mrb[16].mxu0 %v2181_v17 }
 0x4f9   :  { %2558 = vmatpush1.bf16.msra.mxu0 %v3518_v4  ;;  %2589 = vmatprep.mubr.bf16.mxu0 %v2184_v6 }
 0x4fa   :  { %2559 = vmatprep.subr.bf16.mxu0 %v3523_v5  ;;  %3156 = vmatpush3.bf16.msra.mxu1 %v3577_v56 }
 0x4fb   :  { %3157 = vmatprep.subr.bf16.mxu1 %v3578_v57 }
 0x4fd   :  { %2560 = vmatpush1.bf16.msra.mxu0 %v3521_v52 }
 0x4fe   :  { %2561 = vmatprep.subr.bf16.mxu0 %v3526_v21  ;;  %3158 = vmatpush3.bf16.msra.mxu1 %v3579_v15 }
 0x4ff   :  { %3159 = vmatprep.subr.bf16.mxu1 %v3580_v58 }
 0x501   :  { %2562 = vmatpush1.bf16.msra.mxu0 %v3524_v7 }
 0x502   :  { %2563 = vmatprep.subr.bf16.mxu0 %v3529_v53  ;;  %3160 = vmatpush3.bf16.msra.mxu1 %v3581_v59 }
 0x505   :  { %2564 = vmatpush1.bf16.msra.mxu0 %v3527_v8  ;;  %v3084_v8 = vld [vmem:[#allocation10 + $0x14] ss:$0 sm:$0xff] }
 0x506   :  { %2565 = vmatprep.subr.bf16.mxu0 %v3532_v9 }
 0x509   :  { %2566 = vmatpush1.bf16.msra.mxu0 %v3530_v10 }
 0x50a   :  { %2567 = vmatprep.subr.bf16.mxu0 %v3535_v11 }
 0x50d   :  { %2568 = vmatpush1.bf16.msra.mxu0 %v3533_v13 }
 0x50e   :  { %2569 = vmatprep.subr.bf16.mxu0 %v3538_v14 }
 0x511   :  { %2570 = vmatpush1.bf16.msra.mxu0 %v3536_v30 }
 0x512   :  { %2571 = vmatprep.subr.bf16.mxu0 %v3541_v32 }
 0x515   :  { %2572 = vmatpush1.bf16.msra.mxu0 %v3539_v16 }
 0x516   :  { %2573 = vmatprep.subr.bf16.mxu0 %v3544_v18 }
 0x519   :  { %2574 = vmatpush1.bf16.msra.mxu0 %v3542_v19 }
 0x51a   :  { %2575 = vmatprep.subr.bf16.mxu0 %v3547_v20 }
 0x51d   :  { %2576 = vmatpush1.bf16.msra.mxu0 %v3545_v23 }
 0x51e   :  { %2577 = vmatprep.subr.bf16.mxu0 %v3550_v24 }
 0x521   :  { %2578 = vmatpush1.bf16.msra.mxu0 %v3548_v25 }
 0x522   :  { %2579 = vmatprep.subr.bf16.mxu0 %v3553_v26 }
 0x525   :  { %2580 = vmatpush1.bf16.msra.mxu0 %v3551_v28 }
 0x526   :  { %2581 = vmatprep.subr.bf16.mxu0 %v3556_v29 }
 0x529   :  { %2582 = vmatpush1.bf16.msra.mxu0 %v3554_v31 }
 0x52a   :  { %2583 = vmatprep.subr.bf16.mxu0 %v3559_v33 }
 0x52d   :  { %2584 = vmatpush1.bf16.msra.mxu0 %v3557_v34 }
 0x52e   :  { %2585 = vmatprep.subr.bf16.mxu0 %v3562_v35 }
 0x531   :  { %2586 = vmatpush1.bf16.msra.mxu0 %v3560_v36 }
 0x532   :  { %2587 = vmatprep.subr.bf16.mxu0 %v3565_v37 }
 0x535   :  { %2588 = vmatpush1.bf16.msra.mxu0 %v3563_v38 }
 0x538   :  { %2590 = vmatmul.mubr.bf16.vlgmr.msra.gmra.mrb[16].mxu0 %v2183_v39 }
 0x60b   :  { %v2591_v61 = vpop.f32.mrb[16].mxu0 }
 0x60c   :  { %v3167_v0 = vadd.f32 %v2591_v61, %v2189_v60  ;;  %v2593_v62 = vpop.f32.mrb[17].mxu0 }
 0x60d   :  { %v3168_v63 = vadd.f32 %v2593_v62, %v2193_v48  ;;  %v2595_v22 = vpop.f32.mrb[18].mxu0 }
 0x60e   :  { %v3082_v1 = vmul.f32 -1.442695, %v3167_v0  ;;  %v2596_v2 = vpop.f32.mrb[19].mxu0 }
 0x60f   :  { %v3083_v12 = vmul.f32 -1.442695, %v3168_v63 }
 0x610   :  { %3626 = vpow2.f32 %v3082_v1 }
 0x611   :  { %3628 = vpow2.f32 %v3083_v12 }
 0x61a   :  { %v3627_v3 = vpop.eup %3626 }
 0x61b   :  { %v3629_v4 = vpop.eup %3628  ;;  %v2604_v17 = vadd.f32 1.0, %v3627_v3 }
 0x61c   :  { %v2605_v5 = vadd.f32 1.0, %v3629_v4 }
 0x61d   :  { %3630 = vrcp.f32 %v2604_v17 }
 0x61e   :  { %3632 = vrcp.f32 %v2605_v5 }
 0x627   :  { %v3631_v6 = vpop.eup %3630 }
 0x628   :  { %v3633_v49 = vpop.eup %3632  ;;  %v2610_v52 = vmul.f32 %v3631_v6, %v3167_v0 }
 0x629   :  { %v2611_v51 = vmul.f32 %v3633_v49, %v3168_v63 }
 0x62a   :  { %v2644_v7 = vpack.c.bf16 %v2610_v52, %v2610_v52 }
 0x62b   :  { %v2645_v21 = vpack.c.bf16 %v2611_v51, %v2611_v51 }
 0x62d   :  { %2780 = vmatprep.mubr.bf16.mxu1 %v2645_v21 }
 0x62e   :  { %2781 = vmatmul.mubr.bf16.vlgmr.msra.gmra.mrb[24].mxu1 %v2644_v7 }
 0x701   :  { %v3161_v53 = vpop.f32.mrb[24].mxu1 }
 0x702   :  { %v3162_v9 = vpop.f32.mrb[25].mxu1 }
 0x703   :  { %v3163_v10 = vadd.f32 %v3162_v9, %v3161_v53  ;;  %v3164_v11 = vpop.f32.mrb[26].mxu1 }
 0x704   :  { %v3165_v13 = vpop.f32.mrb[27].mxu1 }
 0x705   :  { %v2783_v14 = vadd.f32 %v3163_v10, %v3084_v8 }
 0x707   :  { %2788 = vst [vmem:[#allocation11] sm:$0x3] %v2783_v14 }
 0x708   :  { %3756 = shalt.err (!%p3753_p2)
}
 0x709   :  { %s3757_s8 = scalar_lea.hbm %s4006_s5, 32 }
 0x70a   :  { %p3758_p3 = scmp.ne.s32.totalorder %s4006_s5, %s3757_s8  ;;  %p3761_p4 = scmp.lt.u32.totalorder %s3757_s8, %s4006_s5 }
 0x70c   :  { %p3763_p5 = pnand %p3761_p4, %p3758_p3 }
 0x70e   :  { %3766 = shalt.err (!%p3763_p5)
}
 0x70f   :  { %2798 = dma.vmem_to_hbm [thread:$0]  %s2796_s30, 32, %s4006_s5, [#allocation4]  }
 0x710   :  { %3773 = dma.done.wait [#allocation4], 32  }
 0x711   :  { %3774 = vsyncadd [#allocation4], 4294967264 }
 0x712   :  { %2802 = vsyncpa [#allocation3], 1 }
 0x713   :  { %2803 = vsyncpa [#allocation6], 1 }
 0x714   :  { %2804 = vsyncpa [#allocation9], 1 }
 0x715   :  { %2805 = vsyncpa [#allocation4], 1 }

</bundles_post_ra>
